<compile_context>
chip_gen: v7x
topology: tpu7x:2x2x1
jax: 0.10.0
libtpu: 0.0.40
codegen_flags: <defaults>
</compile_context>

<pallas_src>
import functools

import jax
import jax.numpy as jnp
from jax import lax
from jax.experimental import pallas as pl
from jax.experimental.pallas import tpu as pltpu


def _round_up(x, m):
    return (x + m - 1) // m * m


def _vmem_limit_bytes():
    """Generation-aware VMEM limit with headroom for compiler-internal scratch."""
    cap = None
    try:
        cap = getattr(pltpu.get_tpu_info(), "vmem_capacity_bytes", None)
    except Exception:
        cap = None
    if not cap:
        cap = 64 * 1024 * 1024          # conservative default: v7x per-TC VMEM
    # ~16 MiB headroom; cap at ~100 MiB on the 128 MiB parts (v5e / v6e).
    return int(min(cap - 16 * 1024 * 1024, 100 * 1024 * 1024))


def _conv_kernel(x_ref, w_ref, b_ref, o_ref, *, K, stride, W_ph, L):
    """One batch element: K*K shift-and-accumulate MXU matmuls + bias add.

    x_ref : (n_phases, Cin_pad, Lpad)  phase-split, channel-padded, flattened input
    w_ref : (K*K, Cout_pad, Cin_pad)   conv taps (tap-major)
    b_ref : (Cout_pad, 1)              f32 bias
    o_ref : (Cout_pad, L)              L = round_up(H_out * W_ph, 128), lane-dense
    """
    s = stride
    acc = None
    for kh in range(K):
        for kw in range(K):
            phase = (kh % s) * s + (kw % s)
            off = (kh // s) * W_ph + (kw // s)
            tap = kh * K + kw
            # Contiguous static slice of the flattened spatial axis (no strided
            # gathers); small (Cout_pad, Cin_pad) @ (Cin_pad, L) matmul, f32 acc.
            d = jnp.dot(w_ref[tap], x_ref[phase, :, off:off + L],
                        preferred_element_type=jnp.float32)
            acc = d if acc is None else acc + d
    o_ref[...] = (acc + b_ref[...]).astype(o_ref.dtype)


@functools.partial(jax.jit,
                   static_argnames=("kernel_size", "stride", "upsample", "compute_dtype"))
def conv_block_forward(x_nchw, weight, bias, *, kernel_size, stride, upsample=None,
                       compute_dtype=jnp.bfloat16):
    """Pallas implementation of ConvBlock.forward.

    x_nchw : (N, Cin, H, W)    float32
    weight : (Cout, Cin, K, K) float32   (PyTorch Conv2d layout)
    bias   : (Cout,)           float32
    returns (N, Cout, H_out, W_out)  float32
    """
    K = int(kernel_size)
    s = int(stride)
    pad = K // 2

    x = x_nchw.astype(jnp.float32)

    # nearest-neighbor upsample (F.interpolate(mode='nearest', scale_factor=upsample))
    if upsample:
        u = int(upsample)
        x = jnp.repeat(jnp.repeat(x, u, axis=2), u, axis=3)

    # ReflectionPad2d(K // 2)
    if pad > 0:
        x = jnp.pad(x, ((0, 0), (0, 0), (pad, pad), (pad, pad)), mode="reflect")

    N, Cin, H_pad, W_pad = x.shape
    Cout = weight.shape[0]
    H_out = (H_pad - K) // s + 1
    W_out = (W_pad - K) // s + 1

    # Sublane-aligned channel counts (zero-padded; padded rows/cols contribute 0).
    Cin_pad = _round_up(Cin, 8)
    Cout_pad = _round_up(Cout, 8)

    # Cast to compute dtype early so the (upsampled/padded) intermediate is half-size.
    x = x.astype(compute_dtype)
    if Cin_pad > Cin:
        x = jnp.pad(x, ((0, 0), (0, Cin_pad - Cin), (0, 0), (0, 0)))

    # Phase split (space-to-depth by stride) so every tap is a contiguous slice.
    H_ph = -(-H_pad // s)
    W_ph = -(-W_pad // s)
    if s == 1:
        x_ph = x[:, None]                       # (N, 1, Cin_pad, H_pad, W_pad)
    else:
        x_p = jnp.pad(x, ((0, 0), (0, 0), (0, H_ph * s - H_pad), (0, W_ph * s - W_pad)))
        x_p = x_p.reshape(N, Cin_pad, H_ph, s, W_ph, s)
        x_ph = jnp.transpose(x_p, (0, 3, 5, 1, 2, 4)).reshape(N, s * s, Cin_pad, H_ph, W_ph)
    n_ph = x_ph.shape[1]

    # Flatten spatial dims -> lane-dense input; pad the tail so every tap's
    # contiguous slice of length L_store stays in bounds.
    L_valid = H_out * W_ph
    L_store = _round_up(L_valid, 128)           # unmasked lane-dense output stores
    max_off = ((K - 1) // s) * W_ph + (K - 1) // s
    Lpad = max(H_ph * W_ph, max_off + L_store)
    xf = x_ph.reshape(N, n_ph, Cin_pad, H_ph * W_ph)
    if Lpad > H_ph * W_ph:
        xf = jnp.pad(xf, ((0, 0), (0, 0), (0, 0), (0, Lpad - H_ph * W_ph)))

    # (Cout, Cin, K, K) -> (K*K, Cout_pad, Cin_pad), zero-padded channels.
    w = weight.astype(compute_dtype)
    w = jnp.pad(w, ((0, Cout_pad - Cout), (0, Cin_pad - Cin), (0, 0), (0, 0)))
    w_taps = jnp.transpose(w, (2, 3, 0, 1)).reshape(K * K, Cout_pad, Cin_pad)
    b_col = jnp.pad(bias.astype(jnp.float32), (0, Cout_pad - Cout)).reshape(Cout_pad, 1)

    kernel = functools.partial(_conv_kernel, K=K, stride=s, W_ph=W_ph, L=L_store)

    itemsize = jnp.dtype(compute_dtype).itemsize
    flops = 2 * N * Cout_pad * L_store * K * K * Cin_pad      # what the kernel computes
    bytes_accessed = int(itemsize * (xf.size + w_taps.size)
                         + 4 * (b_col.size + N * Cout_pad * L_store))

    out_flat = pl.pallas_call(
        kernel,
        out_shape=jax.ShapeDtypeStruct((N, Cout_pad, L_store), jnp.float32),
        grid_spec=pltpu.PrefetchScalarGridSpec(
            num_scalar_prefetch=0,
            grid=(N,),
            in_specs=[
                pl.BlockSpec((None, n_ph, Cin_pad, Lpad), lambda n: (n, 0, 0, 0)),
                pl.BlockSpec((K * K, Cout_pad, Cin_pad), lambda n: (0, 0, 0)),
                pl.BlockSpec((Cout_pad, 1), lambda n: (0, 0)),
            ],
            out_specs=pl.BlockSpec((None, Cout_pad, L_store), lambda n: (n, 0, 0)),
        ),
        compiler_params=pltpu.CompilerParams(
            dimension_semantics=("parallel",),
            vmem_limit_bytes=_vmem_limit_bytes(),
        ),
        cost_estimate=pl.CostEstimate(
            flops=flops, transcendentals=0, bytes_accessed=bytes_accessed),
    )(xf, w_taps, b_col)

    # Drop padded channels / garbage lanes (kept in-kernel for lane-dense stores).
    out = out_flat[:, :Cout, :L_valid].reshape(N, Cout, H_out, W_ph)[:, :, :, :W_out]
    return out


def _reference_forward(x_nchw, weight, bias, *, kernel_size, stride, upsample=None):
    """Pure-JAX reference (lax.conv) for correctness checking."""
    K = kernel_size
    pad = K // 2
    x = x_nchw
    if upsample:
        u = int(upsample)
        x = jnp.repeat(jnp.repeat(x, u, axis=2), u, axis=3)
    if pad > 0:
        x = jnp.pad(x, ((0, 0), (0, 0), (pad, pad), (pad, pad)), mode="reflect")
    out = lax.conv_general_dilated(
        x, weight,
        window_strides=(stride, stride),
        padding="VALID",
        dimension_numbers=("NCHW", "OIHW", "NCHW"),
        precision=lax.Precision.HIGHEST,
    )
    return out + bias.reshape(1, -1, 1, 1)


if __name__ == "__main__":
    key = jax.random.PRNGKey(0)
    k_x, k_w, k_b = jax.random.split(key, 3)

    # ConvBlock(in_channels=4, out_channels=8, kernel_size=3, stride, upsample)
    N, Cin, H, W = 2, 4, 16, 16
    Cout, K = 8, 3

    x = jax.random.normal(k_x, (N, Cin, H, W), dtype=jnp.float32)
    fan_in = Cin * K * K
    bound = 1.0 / (fan_in ** 0.5)
    weight = jax.random.uniform(k_w, (Cout, Cin, K, K), jnp.float32, -bound, bound)
    bias = jax.random.uniform(k_b, (Cout,), jnp.float32, -bound, bound)

    # Matched-precision reference operands for the bf16 compute path (products of
    # bf16 values are exact in f32, so only accumulation order differs).
    xq = x.astype(jnp.bfloat16).astype(jnp.float32)
    wq = weight.astype(jnp.bfloat16).astype(jnp.float32)

    cases = [
        dict(stride=1, upsample=2, out_hw=(2 * H, 2 * W)),     # upsampling ConvBlock
        dict(stride=1, upsample=None, out_hw=(H, W)),          # plain ConvBlock
        dict(stride=2, upsample=None, out_hw=(H // 2, W // 2)),  # downsampling (phase split)
    ]
    for c in cases:
        out = jax.block_until_ready(conv_block_forward(
            x, weight, bias, kernel_size=K, stride=c["stride"], upsample=c["upsample"]))
        ref_q = _reference_forward(xq, wq, bias, kernel_size=K,
                                   stride=c["stride"], upsample=c["upsample"])
        ref_f = _reference_forward(x, weight, bias, kernel_size=K,
                                   stride=c["stride"], upsample=c["upsample"])
        assert out.shape == (N, Cout) + c["out_hw"], (out.shape, c)
        # Tight check vs the matched-precision (bf16-rounded operands) reference.
        assert jnp.allclose(out, ref_q, atol=1e-4, rtol=1e-4)
        # Loose check vs the true f32 reference (bf16 operand-rounding tolerance).
        assert jnp.allclose(out, ref_f, atol=1e-1, rtol=5e-2)

    # Full-precision compute path must match the f32 reference tightly.
    out32 = jax.block_until_ready(conv_block_forward(
        x, weight, bias, kernel_size=K, stride=1, upsample=2,
        compute_dtype=jnp.float32))
    ref32 = _reference_forward(x, weight, bias, kernel_size=K, stride=1, upsample=2)
    assert out32.shape == ref32.shape == (N, Cout, 2 * H, 2 * W)
    assert jnp.allclose(out32, ref32, atol=1e-4, rtol=1e-4)

    print("KERNEL_OK")
</pallas_src>

<mosaic_0001>
module attributes {stable_mosaic.version = 11 : i64} {
  func.func @_conv_kernel(%arg0: i32, %arg1: memref<1x1x8x1222xbf16, #tpu.memory_space<vmem>>, %arg2: memref<9x8x8xbf16, #tpu.memory_space<vmem>>, %arg3: memref<8x1xf32, #tpu.memory_space<vmem>>, %arg4: memref<1x8x1152xf32, #tpu.memory_space<vmem>>) attributes {dimension_semantics = [#tpu.dimension_semantics<parallel>], iteration_bounds = array<i64: 2>, scalar_prefetch = 0 : i64, scratch_operands = 0 : i64, tpu.core_type = #tpu.core_type<tc>, window_params = [{transform_indices = @transform_0, window_bounds = array<i64: 1, 1, 8, 1222>}, {pipeline_mode = #tpu.pipeline_mode<synchronous>, transform_indices = @transform_1, window_bounds = array<i64: 9, 8, 8>}, {pipeline_mode = #tpu.pipeline_mode<synchronous>, transform_indices = @transform_2, window_bounds = array<i64: 8, 1>}, {transform_indices = @transform_3, window_bounds = array<i64: 1, 8, 1152>}]} {
    %c0 = arith.constant 0 : index
    %c0_0 = arith.constant 0 : index
    %c0_1 = arith.constant 0 : index
    %0 = vector.load %arg2[%c0, %c0_0, %c0_1] : memref<9x8x8xbf16, #tpu.memory_space<vmem>>, vector<1x8x8xbf16>
    %1 = vector.shape_cast %0 : vector<1x8x8xbf16> to vector<8x8xbf16>
    %c0_2 = arith.constant 0 : index
    %c0_3 = arith.constant 0 : index
    %c0_4 = arith.constant 0 : index
    %c0_5 = arith.constant 0 : index
    %2 = vector.load %arg1[%c0_2, %c0_3, %c0_4, %c0_5] : memref<1x1x8x1222xbf16, #tpu.memory_space<vmem>>, vector<1x1x8x1152xbf16>
    %3 = vector.shape_cast %2 : vector<1x1x8x1152xbf16> to vector<8x1152xbf16>
    %cst = arith.constant dense<0.000000e+00> : vector<8x1152xf32>
    %4 = tpu.matmul %1, %3, %cst {dimension_numbers = #tpu.dot_dimension_numbers<[1], [0], [0], [1], [0, 0, 1, 1], [], []>} : vector<8x8xbf16>, vector<8x1152xbf16>, vector<8x1152xf32> -> vector<8x1152xf32>
    %c1 = arith.constant 1 : index
    %c0_6 = arith.constant 0 : index
    %c0_7 = arith.constant 0 : index
    %5 = vector.load %arg2[%c1, %c0_6, %c0_7] : memref<9x8x8xbf16, #tpu.memory_space<vmem>>, vector<1x8x8xbf16>
    %6 = vector.shape_cast %5 : vector<1x8x8xbf16> to vector<8x8xbf16>
    %c0_8 = arith.constant 0 : index
    %c0_9 = arith.constant 0 : index
    %c0_10 = arith.constant 0 : index
    %c1_11 = arith.constant 1 : index
    %7 = vector.load %arg1[%c0_8, %c0_9, %c0_10, %c1_11] : memref<1x1x8x1222xbf16, #tpu.memory_space<vmem>>, vector<1x1x8x1152xbf16>
    %8 = vector.shape_cast %7 : vector<1x1x8x1152xbf16> to vector<8x1152xbf16>
    %cst_12 = arith.constant dense<0.000000e+00> : vector<8x1152xf32>
    %9 = tpu.matmul %6, %8, %cst_12 {dimension_numbers = #tpu.dot_dimension_numbers<[1], [0], [0], [1], [0, 0, 1, 1], [], []>} : vector<8x8xbf16>, vector<8x1152xbf16>, vector<8x1152xf32> -> vector<8x1152xf32>
    %10 = arith.addf %4, %9 : vector<8x1152xf32>
    %c2 = arith.constant 2 : index
    %c0_13 = arith.constant 0 : index
    %c0_14 = arith.constant 0 : index
    %11 = vector.load %arg2[%c2, %c0_13, %c0_14] : memref<9x8x8xbf16, #tpu.memory_space<vmem>>, vector<1x8x8xbf16>
    %12 = vector.shape_cast %11 : vector<1x8x8xbf16> to vector<8x8xbf16>
    %c0_15 = arith.constant 0 : index
    %c0_16 = arith.constant 0 : index
    %c0_17 = arith.constant 0 : index
    %c2_18 = arith.constant 2 : index
    %13 = vector.load %arg1[%c0_15, %c0_16, %c0_17, %c2_18] : memref<1x1x8x1222xbf16, #tpu.memory_space<vmem>>, vector<1x1x8x1152xbf16>
    %14 = vector.shape_cast %13 : vector<1x1x8x1152xbf16> to vector<8x1152xbf16>
    %cst_19 = arith.constant dense<0.000000e+00> : vector<8x1152xf32>
    %15 = tpu.matmul %12, %14, %cst_19 {dimension_numbers = #tpu.dot_dimension_numbers<[1], [0], [0], [1], [0, 0, 1, 1], [], []>} : vector<8x8xbf16>, vector<8x1152xbf16>, vector<8x1152xf32> -> vector<8x1152xf32>
    %16 = arith.addf %10, %15 : vector<8x1152xf32>
    %c3 = arith.constant 3 : index
    %c0_20 = arith.constant 0 : index
    %c0_21 = arith.constant 0 : index
    %17 = vector.load %arg2[%c3, %c0_20, %c0_21] : memref<9x8x8xbf16, #tpu.memory_space<vmem>>, vector<1x8x8xbf16>
    %18 = vector.shape_cast %17 : vector<1x8x8xbf16> to vector<8x8xbf16>
    %c0_22 = arith.constant 0 : index
    %c0_23 = arith.constant 0 : index
    %c0_24 = arith.constant 0 : index
    %c34 = arith.constant 34 : index
    %19 = vector.load %arg1[%c0_22, %c0_23, %c0_24, %c34] : memref<1x1x8x1222xbf16, #tpu.memory_space<vmem>>, vector<1x1x8x1152xbf16>
    %20 = vector.shape_cast %19 : vector<1x1x8x1152xbf16> to vector<8x1152xbf16>
    %cst_25 = arith.constant dense<0.000000e+00> : vector<8x1152xf32>
    %21 = tpu.matmul %18, %20, %cst_25 {dimension_numbers = #tpu.dot_dimension_numbers<[1], [0], [0], [1], [0, 0, 1, 1], [], []>} : vector<8x8xbf16>, vector<8x1152xbf16>, vector<8x1152xf32> -> vector<8x1152xf32>
    %22 = arith.addf %16, %21 : vector<8x1152xf32>
    %c4 = arith.constant 4 : index
    %c0_26 = arith.constant 0 : index
    %c0_27 = arith.constant 0 : index
    %23 = vector.load %arg2[%c4, %c0_26, %c0_27] : memref<9x8x8xbf16, #tpu.memory_space<vmem>>, vector<1x8x8xbf16>
    %24 = vector.shape_cast %23 : vector<1x8x8xbf16> to vector<8x8xbf16>
    %c0_28 = arith.constant 0 : index
    %c0_29 = arith.constant 0 : index
    %c0_30 = arith.constant 0 : index
    %c35 = arith.constant 35 : index
    %25 = vector.load %arg1[%c0_28, %c0_29, %c0_30, %c35] : memref<1x1x8x1222xbf16, #tpu.memory_space<vmem>>, vector<1x1x8x1152xbf16>
    %26 = vector.shape_cast %25 : vector<1x1x8x1152xbf16> to vector<8x1152xbf16>
    %cst_31 = arith.constant dense<0.000000e+00> : vector<8x1152xf32>
    %27 = tpu.matmul %24, %26, %cst_31 {dimension_numbers = #tpu.dot_dimension_numbers<[1], [0], [0], [1], [0, 0, 1, 1], [], []>} : vector<8x8xbf16>, vector<8x1152xbf16>, vector<8x1152xf32> -> vector<8x1152xf32>
    %28 = arith.addf %22, %27 : vector<8x1152xf32>
    %c5 = arith.constant 5 : index
    %c0_32 = arith.constant 0 : index
    %c0_33 = arith.constant 0 : index
    %29 = vector.load %arg2[%c5, %c0_32, %c0_33] : memref<9x8x8xbf16, #tpu.memory_space<vmem>>, vector<1x8x8xbf16>
    %30 = vector.shape_cast %29 : vector<1x8x8xbf16> to vector<8x8xbf16>
    %c0_34 = arith.constant 0 : index
    %c0_35 = arith.constant 0 : index
    %c0_36 = arith.constant 0 : index
    %c36 = arith.constant 36 : index
    %31 = vector.load %arg1[%c0_34, %c0_35, %c0_36, %c36] : memref<1x1x8x1222xbf16, #tpu.memory_space<vmem>>, vector<1x1x8x1152xbf16>
    %32 = vector.shape_cast %31 : vector<1x1x8x1152xbf16> to vector<8x1152xbf16>
    %cst_37 = arith.constant dense<0.000000e+00> : vector<8x1152xf32>
    %33 = tpu.matmul %30, %32, %cst_37 {dimension_numbers = #tpu.dot_dimension_numbers<[1], [0], [0], [1], [0, 0, 1, 1], [], []>} : vector<8x8xbf16>, vector<8x1152xbf16>, vector<8x1152xf32> -> vector<8x1152xf32>
    %34 = arith.addf %28, %33 : vector<8x1152xf32>
    %c6 = arith.constant 6 : index
    %c0_38 = arith.constant 0 : index
    %c0_39 = arith.constant 0 : index
    %35 = vector.load %arg2[%c6, %c0_38, %c0_39] : memref<9x8x8xbf16, #tpu.memory_space<vmem>>, vector<1x8x8xbf16>
    %36 = vector.shape_cast %35 : vector<1x8x8xbf16> to vector<8x8xbf16>
    %c0_40 = arith.constant 0 : index
    %c0_41 = arith.constant 0 : index
    %c0_42 = arith.constant 0 : index
    %c68 = arith.constant 68 : index
    %37 = vector.load %arg1[%c0_40, %c0_41, %c0_42, %c68] : memref<1x1x8x1222xbf16, #tpu.memory_space<vmem>>, vector<1x1x8x1152xbf16>
    %38 = vector.shape_cast %37 : vector<1x1x8x1152xbf16> to vector<8x1152xbf16>
    %cst_43 = arith.constant dense<0.000000e+00> : vector<8x1152xf32>
    %39 = tpu.matmul %36, %38, %cst_43 {dimension_numbers = #tpu.dot_dimension_numbers<[1], [0], [0], [1], [0, 0, 1, 1], [], []>} : vector<8x8xbf16>, vector<8x1152xbf16>, vector<8x1152xf32> -> vector<8x1152xf32>
    %40 = arith.addf %34, %39 : vector<8x1152xf32>
    %c7 = arith.constant 7 : index
    %c0_44 = arith.constant 0 : index
    %c0_45 = arith.constant 0 : index
    %41 = vector.load %arg2[%c7, %c0_44, %c0_45] : memref<9x8x8xbf16, #tpu.memory_space<vmem>>, vector<1x8x8xbf16>
    %42 = vector.shape_cast %41 : vector<1x8x8xbf16> to vector<8x8xbf16>
    %c0_46 = arith.constant 0 : index
    %c0_47 = arith.constant 0 : index
    %c0_48 = arith.constant 0 : index
    %c69 = arith.constant 69 : index
    %43 = vector.load %arg1[%c0_46, %c0_47, %c0_48, %c69] : memref<1x1x8x1222xbf16, #tpu.memory_space<vmem>>, vector<1x1x8x1152xbf16>
    %44 = vector.shape_cast %43 : vector<1x1x8x1152xbf16> to vector<8x1152xbf16>
    %cst_49 = arith.constant dense<0.000000e+00> : vector<8x1152xf32>
    %45 = tpu.matmul %42, %44, %cst_49 {dimension_numbers = #tpu.dot_dimension_numbers<[1], [0], [0], [1], [0, 0, 1, 1], [], []>} : vector<8x8xbf16>, vector<8x1152xbf16>, vector<8x1152xf32> -> vector<8x1152xf32>
    %46 = arith.addf %40, %45 : vector<8x1152xf32>
    %c8 = arith.constant 8 : index
    %c0_50 = arith.constant 0 : index
    %c0_51 = arith.constant 0 : index
    %47 = vector.load %arg2[%c8, %c0_50, %c0_51] : memref<9x8x8xbf16, #tpu.memory_space<vmem>>, vector<1x8x8xbf16>
    %48 = vector.shape_cast %47 : vector<1x8x8xbf16> to vector<8x8xbf16>
    %c0_52 = arith.constant 0 : index
    %c0_53 = arith.constant 0 : index
    %c0_54 = arith.constant 0 : index
    %c70 = arith.constant 70 : index
    %49 = vector.load %arg1[%c0_52, %c0_53, %c0_54, %c70] : memref<1x1x8x1222xbf16, #tpu.memory_space<vmem>>, vector<1x1x8x1152xbf16>
    %50 = vector.shape_cast %49 : vector<1x1x8x1152xbf16> to vector<8x1152xbf16>
    %cst_55 = arith.constant dense<0.000000e+00> : vector<8x1152xf32>
    %51 = tpu.matmul %48, %50, %cst_55 {dimension_numbers = #tpu.dot_dimension_numbers<[1], [0], [0], [1], [0, 0, 1, 1], [], []>} : vector<8x8xbf16>, vector<8x1152xbf16>, vector<8x1152xf32> -> vector<8x1152xf32>
    %52 = arith.addf %46, %51 : vector<8x1152xf32>
    %c0_56 = arith.constant 0 : index
    %c0_57 = arith.constant 0 : index
    %53 = vector.load %arg3[%c0_56, %c0_57] : memref<8x1xf32, #tpu.memory_space<vmem>>, vector<8x1xf32>
    %54 = vector.broadcast %53 : vector<8x1xf32> to vector<8x1152xf32>
    %55 = arith.addf %52, %54 : vector<8x1152xf32>
    %c0_58 = arith.constant 0 : index
    %c0_59 = arith.constant 0 : index
    %c0_60 = arith.constant 0 : index
    %56 = vector.load %arg4[%c0_58, %c0_59, %c0_60] : memref<1x8x1152xf32, #tpu.memory_space<vmem>>, vector<1x8x1152xf32>
    %57 = vector.shape_cast %56 : vector<1x8x1152xf32> to vector<8x1152xf32>
    %58 = vector.shape_cast %55 : vector<8x1152xf32> to vector<1x8x1152xf32>
    tpu.vector_store %arg4[%c0_58, %c0_59, %c0_60], %58 {strides = array<i32>} : memref<1x8x1152xf32, #tpu.memory_space<vmem>>, vector<1x8x1152xf32>,
    return
  }
  func.func @transform_0(%arg0: i32) -> (i32, i32, i32, i32) {
    %c0_i32 = arith.constant 0 : i32
    %c0_i32_0 = arith.constant 0 : i32
    %c0_i32_1 = arith.constant 0 : i32
    %c0_i32_2 = arith.constant 0 : i32
    return %arg0, %c0_i32, %c0_i32_0, %c0_i32_1 : i32, i32, i32, i32
  }
  func.func @transform_1(%arg0: i32) -> (i32, i32, i32) {
    %c0_i32 = arith.constant 0 : i32
    %c0_i32_0 = arith.constant 0 : i32
    %c0_i32_1 = arith.constant 0 : i32
    %c0_i32_2 = arith.constant 0 : i32
    return %c0_i32, %c0_i32_0, %c0_i32_1 : i32, i32, i32
  }
  func.func @transform_2(%arg0: i32) -> (i32, i32) {
    %c0_i32 = arith.constant 0 : i32
    %c0_i32_0 = arith.constant 0 : i32
    %c0_i32_1 = arith.constant 0 : i32
    return %c0_i32, %c0_i32_0 : i32, i32
  }
  func.func @transform_3(%arg0: i32) -> (i32, i32, i32) {
    %c0_i32 = arith.constant 0 : i32
    %c0_i32_0 = arith.constant 0 : i32
    %c0_i32_1 = arith.constant 0 : i32
    return %arg0, %c0_i32, %c0_i32_0 : i32, i32, i32
  }
}

</mosaic_0001>

<bundles_post_ra>
// kernel: conv_block_forward.1
= control target key start
LH: loop header
LB: loop body
LE: loop exit
PB: predicated region body
PF: predicated region fallthrough
CT: control target
= control target key end

     0   :  { %s2966_s12 = smov 0   ;;  %s3426_s0 = inlined_call_operand.vmem [shape: bf16[2,1,8,1222], index: 0, kind: input, shape index: {}]   ;;  %s3427_s1 = inlined_call_operand.vmem [shape: bf16[9,8,8], index: 1, kind: input, shape index: {}]   ;;  %s3428_s2 = inlined_call_operand.vmem [shape: f32[8,1], index: 2, kind: input, shape index: {}]   ;;  %s3429_s3 = inlined_call_operand.vmem [shape: f32[2,8,1152], index: 3, kind: output, shape index: {}]  }
   0x1 LB: > { %s2713_s13 = sadd.s32 4294967295, %s2933_s12   ;;  %p2717_p0 = scmp.ge.s32.totalorder %s2933_s12, 1  ;;  %s2933_s12 = sphi %s2966_s12, %s13_s12  }
   0x2   : > { %p137_p1 = scmp.lt.s32.totalorder %s2933_s12, 3 }
   0x4   : > { %p138_p2 = pnand %p2717_p0, %p137_p1 }
   0x5   : > { %p161_p3 = scmp.lt.s32.totalorder (!%p138_p2), %s2713_s13, 1  ;;  %v2935_v0 = vmov (!%p138_p2), 0   ;;  %s2936_s18 = smov (!%p138_p2), 127   ;;  %vm226_vm0 = vcmask (!%p138_p2), 1039360   ;;  %vm240_vm1 = vcmask (!%p138_p2), 1043456   ;;  %vm236_vm2 = vcmask (!%p138_p2), 64512  }
   0x6   : > { %141 = sbr.rel (%p138_p2) target bundleno = 537 (0x219), region = 32  ;;  %300 = vmatprep.mubr.bf16.mxu0 (!%p138_p2), %v2935_v0  ;;  %341 = vmatprep.mubr.bf16.mxu1 (!%p138_p2), %v2935_v0  ;;  %s2937_s19 = smov (!%p138_p2), 126   ;;  %v2720_v23 = vld [vmem:[%s3427_s1 + $0x4] sm:$0xf] (!%p138_p2)  ;;  %v2943_v37 = vmov (!%p138_p2), 0.0   ;;  %vm2944_vm3 = vmmov (!%p138_p2), 0  }
   0x7   : > { %2915 = vset.pattern.permute.xlu0 (!%p138_p2), %v2935_v0  ;;  %s2938_s20 = smov (!%p138_p2), 94   ;;  %s2939_s21 = smov (!%p138_p2), 93   ;;  %v172_v48 = vld [vmem:[%s3427_s1] sm:$0xf] (!%p138_p2)  ;;  %vm731_vm4 = vcmask (!%p138_p2), 1031168   ;;  %vm1006_vm5 = vcmask (!%p138_p2), 769024  }
   0x8   : > { %s2940_s22 = smov (!%p138_p2), 92   ;;  %s2941_s23 = smov (!%p138_p2), 60   ;;  %vm1281_vm6 = vcmask (!%p138_p2), 760832   ;;  %vm1556_vm7 = vcmask (!%p138_p2), 752640   ;;  %vm1831_vm8 = vcmask (!%p138_p2), 490496   ;;  %vm2106_vm9 = vcmask (!%p138_p2), 482304  }
   0x9   : > { %s2942_s24 = smov (!%p138_p2), 59   ;;  %s2945_s29 = smov (!%p138_p2), 58   ;;  %vm2381_vm10 = vcmask (!%p138_p2), 474112  }
   0xd   : > { %s3431_s13 = smov (!%p161_p3, %s2713_s13), 1 }
   0xe   : > { %s2894_s14 = smul.u32 40, %s3431_s13 }
  0x10   : > { %s2982_s17 = scalar_lea.vmem %s3426_s0, %s2894_s14 }
  0x11   : > { %v174_v1 = vld [vmem:[%s2982_s17 + $0x8] sm:$0xff]  ;;  %v173_v2 = vld [vmem:[%s2982_s17] sm:$0xff]  ;;  %v175_v7 = vld [vmem:[%s2982_s17 + $0x10] sm:$0xff] }
  0x12   : > { %v2987_v3 = vcombine.low %v174_v1, %v174_v1  ;;  %v2989_v4 = vcombine.low %v173_v2, %v173_v2  ;;  %v2993_v5 = vcombine.high %v174_v1, %v174_v1  ;;  %v2995_v6 = vcombine.high %v173_v2, %v173_v2  ;;  %v176_v10 = vld [vmem:[%s2982_s17 + $0x18] sm:$0xff]  ;;  %v180_v13 = vld [vmem:[%s2982_s17 + $0x20] sm:$0xff] }
  0x13   : > { %v3000_v8 = vcombine.high %v175_v7, %v175_v7  ;;  %v3002_v9 = vcombine.low %v175_v7, %v175_v7  ;;  %v3007_v11 = vcombine.high %v176_v10, %v176_v10  ;;  %v3009_v12 = vcombine.low %v176_v10, %v176_v10  ;;  %v2926_v53 = vld [vmem:[%s2982_s17 + $0x20] ss:$0 sps:$4 sm:$0xff]  }
  0x14   : > { %210 = vrot.lane.b32.xlu1 %v2987_v3, %s2936_s18  ;;  %206 = vrot.lane.b32.xlu0 %v2989_v4, %s2936_s18  ;;  %v3014_v14 = vcombine.low %v180_v13, %v180_v13  ;;  %v3016_v15 = vcombine.high %v180_v13, %v180_v13  ;;  %v479_v42 = vsel %vm240_vm1, %v2989_v4, 0  ;;  %v485_v45 = vsel %vm240_vm1, %v2987_v3, 0 }
  0x15   : > { %v491_v49 = vsel %vm240_vm1, %v3002_v9, 0  ;;  %v497_v52 = vsel %vm240_vm1, %v3009_v12, 0  ;;  %v503_v57 = vsel %vm240_vm1, %v2926_v53, 0 }
  0x18   : > { %212 = vrot.lane.b32.xlu1 %v2993_v5, %s2936_s18  ;;  %208 = vrot.lane.b32.xlu0 %v2995_v6, %s2936_s18 }
  0x1c   : > { %216 = vrot.lane.b32.xlu1 %v3000_v8, %s2936_s18  ;;  %214 = vrot.lane.b32.xlu0 %v3002_v9, %s2936_s18 }
  0x20   : > { %220 = vrot.lane.b32.xlu1 %v3007_v11, %s2936_s18  ;;  %218 = vrot.lane.b32.xlu0 %v3009_v12, %s2936_s18 }
  0x24   : > { %222 = vrot.lane.b32.xlu0 %v3014_v14, %s2936_s18  ;;  %224 = vrot.lane.b32.xlu1 %v3016_v15, %s2936_s18 }
  0x28   : > { %711 = vrot.lane.b32.xlu0 %v2989_v4, %s2937_s19  ;;  %713 = vrot.lane.b32.xlu1 %v2995_v6, %s2937_s19 }
  0x2c   : > { %715 = vrot.lane.b32.xlu0 %v2987_v3, %s2937_s19  ;;  %717 = vrot.lane.b32.xlu1 %v2993_v5, %s2937_s19 }
  0x30   : > { %719 = vrot.lane.b32.xlu0 %v3002_v9, %s2937_s19  ;;  %721 = vrot.lane.b32.xlu1 %v3000_v8, %s2937_s19 }
  0x34   : > { %723 = vrot.lane.b32.xlu0 %v3009_v12, %s2937_s19  ;;  %725 = vrot.lane.b32.xlu1 %v3007_v11, %s2937_s19 }
  0x38   : > { %727 = vrot.lane.b32.xlu0 %v3014_v14, %s2937_s19  ;;  %729 = vrot.lane.b32.xlu1 %v3016_v15, %s2937_s19 }
  0x3c   : > { %986 = vrot.lane.b32.xlu0 %v2989_v4, %s2938_s20  ;;  %988 = vrot.lane.b32.xlu1 %v2995_v6, %s2938_s20 }
  0x40   : > { %990 = vrot.lane.b32.xlu0 %v2987_v3, %s2938_s20  ;;  %992 = vrot.lane.b32.xlu1 %v2993_v5, %s2938_s20 }
  0x44   : > { %994 = vrot.lane.b32.xlu0 %v3002_v9, %s2938_s20  ;;  %996 = vrot.lane.b32.xlu1 %v3000_v8, %s2938_s20 }
  0x48   : > { %998 = vrot.lane.b32.xlu0 %v3009_v12, %s2938_s20  ;;  %1000 = vrot.lane.b32.xlu1 %v3007_v11, %s2938_s20 }
  0x4c   : > { %1002 = vrot.lane.b32.xlu0 %v3014_v14, %s2938_s20  ;;  %1004 = vrot.lane.b32.xlu1 %v3016_v15, %s2938_s20 }
  0x50   : > { %1261 = vrot.lane.b32.xlu0 %v2989_v4, %s2939_s21  ;;  %1263 = vrot.lane.b32.xlu1 %v2995_v6, %s2939_s21 }
  0x54   : > { %1265 = vrot.lane.b32.xlu0 %v2987_v3, %s2939_s21  ;;  %1267 = vrot.lane.b32.xlu1 %v2993_v5, %s2939_s21 }
  0x58   : > { %1269 = vrot.lane.b32.xlu0 %v3002_v9, %s2939_s21  ;;  %1271 = vrot.lane.b32.xlu1 %v3000_v8, %s2939_s21 }
  0x5c   : > { %1273 = vrot.lane.b32.xlu0 %v3009_v12, %s2939_s21  ;;  %1275 = vrot.lane.b32.xlu1 %v3007_v11, %s2939_s21 }
  0x60   : > { %1277 = vrot.lane.b32.xlu0 %v3014_v14, %s2939_s21  ;;  %1279 = vrot.lane.b32.xlu1 %v3016_v15, %s2939_s21  ;;  %s2895_s21 = smul.u32 72, %s3431_s13 }
  0x64   : > { %1536 = vrot.lane.b32.xlu0 %v2989_v4, %s2940_s22  ;;  %1538 = vrot.lane.b32.xlu1 %v2995_v6, %s2940_s22 }
  0x68   : > { %1540 = vrot.lane.b32.xlu0 %v2987_v3, %s2940_s22  ;;  %1542 = vrot.lane.b32.xlu1 %v2993_v5, %s2940_s22 }
  0x6c   : > { %1544 = vrot.lane.b32.xlu0 %v3002_v9, %s2940_s22  ;;  %1546 = vrot.lane.b32.xlu1 %v3000_v8, %s2940_s22 }
  0x70   : > { %1548 = vrot.lane.b32.xlu0 %v3009_v12, %s2940_s22  ;;  %1550 = vrot.lane.b32.xlu1 %v3007_v11, %s2940_s22 }
  0x74   : > { %1552 = vrot.lane.b32.xlu0 %v3014_v14, %s2940_s22  ;;  %1554 = vrot.lane.b32.xlu1 %v3016_v15, %s2940_s22 }
  0x78   : > { %1811 = vrot.lane.b32.xlu0 %v2989_v4, %s2941_s23  ;;  %1813 = vrot.lane.b32.xlu1 %v2995_v6, %s2941_s23 }
  0x7c   : > { %1815 = vrot.lane.b32.xlu0 %v2987_v3, %s2941_s23  ;;  %1817 = vrot.lane.b32.xlu1 %v2993_v5, %s2941_s23 }
  0x80   : > { %1819 = vrot.lane.b32.xlu0 %v3002_v9, %s2941_s23  ;;  %1821 = vrot.lane.b32.xlu1 %v3000_v8, %s2941_s23 }
  0x84   : > { %1823 = vrot.lane.b32.xlu0 %v3009_v12, %s2941_s23  ;;  %1825 = vrot.lane.b32.xlu1 %v3007_v11, %s2941_s23 }
  0x86   : > { %v211_v16 = vpop.permute.xlu1 %210  ;;  %v207_v17 = vpop.permute.xlu0 %206 }
  0x88   : > { %1827 = vrot.lane.b32.xlu0 %v3014_v14, %s2941_s23  ;;  %1829 = vrot.lane.b32.xlu1 %v3016_v15, %s2941_s23 }
  0x8a   : > { %v213_v18 = vpop.permute.xlu1 %212  ;;  %v209_v19 = vpop.permute.xlu0 %208 }
  0x8b   : > { %v228_v20 = vsel %vm226_vm0, %v209_v19, %v211_v16  ;;  %v227_v21 = vsel %vm226_vm0, %v207_v17, %v209_v19  ;;  %v229_v24 = vsel %vm226_vm0, %v211_v16, %v213_v18 }
  0x8c   : > { %2731 = vmatprep.subr.msk.bf16.mxu0 %vm240_vm1, %v228_v20  ;;  %v242_v22 = vsel %vm240_vm1, %v227_v21, 0  ;;  %2086 = vrot.lane.b32.xlu0 %v2989_v4, %s2942_s24  ;;  %v248_v28 = vsel %vm240_vm1, %v229_v24, 0 }
  0x8d   : > { %269 = vmatpush1.bf16.msra.mxu0 %v242_v22  ;;  %2088 = vrot.lane.b32.xlu1 %v2995_v6, %s2942_s24 }
  0x8e   : > { %v217_v25 = vpop.permute.xlu1 %216  ;;  %v215_v26 = vpop.permute.xlu0 %214 }
  0x8f   : > { %v230_v27 = vsel %vm226_vm0, %v213_v18, %v215_v26  ;;  %v231_v29 = vsel %vm226_vm0, %v215_v26, %v217_v25 }
  0x90   : > { %2732 = vmatmul.mubr.msk.bf16.vlgmr.msra.gmra.mrb[0].mxu0 %vm236_vm2, %v2720_v23  ;;  %2733 = vmatprep.subr.msk.bf16.mxu1 %vm240_vm1, %v230_v27  ;;  %v254_v33 = vsel %vm240_vm1, %v231_v29, 0 }
  0x91   : > { %310 = vmatpush1.bf16.msra.mxu1 %v248_v28  ;;  %382 = vmatprep.mubr.bf16.mxu0 %v2935_v0 }
  0x92   : > { %v221_v30 = vpop.permute.xlu1 %220  ;;  %v219_v31 = vpop.permute.xlu0 %218  ;;  %2090 = vrot.lane.b32.xlu0 %v2987_v3, %s2942_s24  ;;  %2092 = vrot.lane.b32.xlu1 %v2993_v5, %s2942_s24 }
  0x93   : > { %v232_v32 = vsel %vm226_vm0, %v217_v25, %v219_v31  ;;  %v233_v34 = vsel %vm226_vm0, %v219_v31, %v221_v30 }
  0x94   : > { %2734 = vmatmul.mubr.msk.bf16.vlgmr.msra.gmra.mrb[0].mxu1 %vm236_vm2, %v2720_v23  ;;  %2735 = vmatprep.subr.msk.bf16.mxu0 %vm240_vm1, %v232_v32  ;;  %v260_v40 = vsel %vm240_vm1, %v233_v34, 0  ;;  %v2760_v34 = vld [vmem:[%s3427_s1 + $0xc] sm:$0xf] }
  0x95   : > { %351 = vmatpush1.bf16.msra.mxu0 %v254_v33  ;;  %423 = vmatprep.mubr.bf16.mxu1 %v2935_v0 }
  0x96   : > { %v223_v35 = vpop.permute.xlu0 %222  ;;  %v225_v36 = vpop.permute.xlu1 %224  ;;  %2840 = vmatprep.subr.bf16.mxu0 %v2943_v37  ;;  %2094 = vrot.lane.b32.xlu0 %v3002_v9, %s2942_s24 }
  0x97   : > { %v234_v38 = vsel %vm226_vm0, %v221_v30, %v223_v35  ;;  %v235_v39 = vsel %vm226_vm0, %v223_v35, %v225_v36  ;;  %2096 = vrot.lane.b32.xlu1 %v3000_v8, %s2942_s24 }
  0x98   : > { %2736 = vmatmul.mubr.msk.bf16.vlgmr.msra.gmra.mrb[4].mxu0 %vm236_vm2, %v2720_v23  ;;  %2737 = vmatprep.subr.msk.bf16.mxu1 %vm240_vm1, %v234_v38  ;;  %v266_v41 = vsel %vm240_vm1, %v235_v39, 0 }
  0x99   : > { %392 = vmatpush1.bf16.msra.mxu1 %v260_v40  ;;  %2841 = vmatpush3.bf16.msra.mxu0 %v266_v41 }
  0x9a   : > { %2842 = vmatprep.mubr.msk.bf16.mxu0 %vm2944_vm3, %v2943_v37  ;;  %2741 = vmatprep.subr.msk.bf16.mxu1 %vm240_vm1, %v2995_v6  ;;  %v712_v43 = vpop.permute.xlu0 %711  ;;  %v714_v44 = vpop.permute.xlu1 %713 }
  0x9b   : > { %2743 = vmatprep.subr.msk.bf16.mxu0 %vm240_vm1, %v2993_v5  ;;  %2098 = vrot.lane.b32.xlu0 %v3009_v12, %s2942_s24  ;;  %v732_v60 = vsel %vm731_vm4, %v712_v43, %v714_v44 }
  0x9c   : > { %2738 = vmatmul.mubr.msk.bf16.vlgmr.msra.gmra.mrb[4].mxu1 %vm236_vm2, %v2720_v23  ;;  %2100 = vrot.lane.b32.xlu1 %v3007_v11, %s2942_s24  ;;  %v745_v62 = vsel %vm240_vm1, %v732_v60, 0  ;;  %v2770_v60 = vld [vmem:[%s3427_s1 + $0x10] sm:$0xf] }
  0x9d   : > { %506 = vmatpush1.bf16.msra.mxu1 %v479_v42  ;;  %537 = vmatprep.mubr.bf16.mxu1 %v2935_v0 }
  0x9e   : > { %2745 = vmatprep.subr.msk.bf16.mxu1 %vm240_vm1, %v3000_v8  ;;  %v716_v46 = vpop.permute.xlu0 %715  ;;  %v718_v47 = vpop.permute.xlu1 %717 }
  0x9f   : > { %2102 = vrot.lane.b32.xlu0 %v3014_v14, %s2942_s24  ;;  %v733_v56 = vsel %vm731_vm4, %v714_v44, %v716_v46  ;;  %v734_v2 = vsel %vm731_vm4, %v716_v46, %v718_v47 }
  0xa0   : > { %2843 = vmatmul.mubr.msk.bf16.vlgmr.msra.gmra.mrb[8].mxu0 %vm236_vm2, %v2720_v23  ;;  %2104 = vrot.lane.b32.xlu1 %v3016_v15, %s2942_s24  ;;  %s3412_s24 = scalar_lea.vmem %s3429_s3, %s2895_s21 }
  0xa1   : > { %547 = vmatpush1.bf16.msra.mxu0 %v485_v45  ;;  %578 = vmatprep.mubr.bf16.mxu0 %v2935_v0 }
  0xa2   : > { %2747 = vmatprep.subr.msk.bf16.mxu0 %vm240_vm1, %v3007_v11  ;;  %v720_v50 = vpop.permute.xlu0 %719  ;;  %v722_v51 = vpop.permute.xlu1 %721 }
  0xa3   : > { %2361 = vrot.lane.b32.xlu0 %v2989_v4, %s2945_s29  ;;  %v735_v61 = vsel %vm731_vm4, %v718_v47, %v720_v50  ;;  %v751_v4 = vsel %vm240_vm1, %v734_v2, 0  ;;  %v736_v7 = vsel %vm731_vm4, %v720_v50, %v722_v51 }
  0xa4   : > { %2742 = vmatmul.mubr.msk.bf16.vlgmr.msra.gmra.mrb[8].mxu1 %vm236_vm2, %v172_v48  ;;  %2363 = vrot.lane.b32.xlu1 %v2995_v6, %s2945_s29  ;;  %v757_v10 = vsel %vm240_vm1, %v736_v7, 0 }
  0xa5   : > { %588 = vmatpush1.bf16.msra.mxu1 %v491_v49  ;;  %619 = vmatprep.mubr.bf16.mxu1 %v2935_v0 }
  0xa6   : > { %2846 = vmatprep.subr.bf16.mxu1 %v2943_v37  ;;  %v724_v54 = vpop.permute.xlu0 %723  ;;  %v726_v55 = vpop.permute.xlu1 %725 }
  0xa7   : > { %2365 = vrot.lane.b32.xlu0 %v2987_v3, %s2945_s29  ;;  %v737_v3 = vsel %vm731_vm4, %v722_v51, %v724_v54  ;;  %v738_v13 = vsel %vm731_vm4, %v724_v54, %v726_v55 }
  0xa8   : > { %2744 = vmatmul.mubr.msk.bf16.vlgmr.msra.gmra.mrb[12].mxu0 %vm236_vm2, %v172_v48  ;;  %2367 = vrot.lane.b32.xlu1 %v2993_v5, %s2945_s29 }
  0xa9   : > { %629 = vmatpush1.bf16.msra.mxu0 %v497_v52  ;;  %660 = vmatprep.mubr.bf16.mxu0 %v2935_v0 }
  0xaa   : > { %2751 = vmatprep.subr.msk.bf16.mxu0 %vm240_vm1, %v733_v56  ;;  %v728_v58 = vpop.permute.xlu0 %727  ;;  %v730_v59 = vpop.permute.xlu1 %729 }
  0xab   : > { %2369 = vrot.lane.b32.xlu0 %v3002_v9, %s2945_s29  ;;  %v2750_v9 = vld [vmem:[%s3427_s1 + $0x8] sm:$0xf]  ;;  %v740_v17 = vsel %vm731_vm4, %v728_v58, %v730_v59 }
  0xac   : > { %2746 = vmatmul.mubr.msk.bf16.vlgmr.msra.gmra.mrb[12].mxu1 %vm236_vm2, %v172_v48  ;;  %2371 = vrot.lane.b32.xlu1 %v3000_v8, %s2945_s29  ;;  %v739_v8 = vsel %vm731_vm4, %v726_v55, %v728_v58  ;;  %v769_v19 = vsel %vm240_vm1, %v740_v17, 0 }
  0xad   : > { %2847 = vmatpush3.bf16.msra.mxu1 %v503_v57  ;;  %2848 = vmatprep.mubr.msk.bf16.mxu1 %vm2944_vm3, %v2943_v37 }
  0xae   : > { %2753 = vmatprep.subr.msk.bf16.mxu1 %vm240_vm1, %v735_v61  ;;  %v987_v63 = vpop.permute.xlu0 %986  ;;  %v989_v1 = vpop.permute.xlu1 %988 }
  0xaf   : > { %2373 = vrot.lane.b32.xlu0 %v3009_v12, %s2945_s29  ;;  %v1007_v22 = vsel %vm1006_vm5, %v987_v63, %v989_v1 }
  0xb0   : > { %2748 = vmatmul.mubr.msk.bf16.vlgmr.msra.gmra.mrb[16].mxu0 %vm236_vm2, %v172_v48  ;;  %2375 = vrot.lane.b32.xlu1 %v3007_v11, %s2945_s29  ;;  %v1020_v24 = vsel %vm240_vm1, %v1007_v22, 0  ;;  %v2780_v22 = vld [vmem:[%s3427_s1 + $0x14] sm:$0xf] }
  0xb1   : > { %772 = vmatpush1.bf16.msra.mxu0 %v745_v62  ;;  %803 = vmatprep.mubr.bf16.mxu0 %v2935_v0 }
  0xb2   : > { %2755 = vmatprep.subr.msk.bf16.mxu0 %vm240_vm1, %v737_v3  ;;  %v991_v5 = vpop.permute.xlu0 %990  ;;  %v993_v6 = vpop.permute.xlu1 %992 }
  0xb3   : > { %2377 = vrot.lane.b32.xlu0 %v3014_v14, %s2945_s29  ;;  %v763_v14 = vsel %vm240_vm1, %v738_v13, 0  ;;  %v1008_v18 = vsel %vm1006_vm5, %v989_v1, %v991_v5  ;;  %v1009_v27 = vsel %vm1006_vm5, %v991_v5, %v993_v6 }
  0xb4   : > { %2849 = vmatmul.mubr.msk.bf16.vlgmr.msra.gmra.mrb[16].mxu1 %vm236_vm2, %v172_v48  ;;  %2379 = vrot.lane.b32.xlu1 %v3016_v15, %s2945_s29  ;;  %v1026_v29 = vsel %vm240_vm1, %v1009_v27, 0 }
  0xb5   : > { %813 = vmatpush1.bf16.msra.mxu1 %v751_v4  ;;  %844 = vmatprep.mubr.bf16.mxu1 %v2935_v0 }
  0xb6   : > { %2757 = vmatprep.subr.msk.bf16.mxu1 %vm240_vm1, %v739_v8  ;;  %v995_v11 = vpop.permute.xlu0 %994  ;;  %v997_v12 = vpop.permute.xlu1 %996 }
  0xb7   : > { %v1010_v23 = vsel %vm1006_vm5, %v993_v6, %v995_v11  ;;  %v1011_v32 = vsel %vm1006_vm5, %v995_v11, %v997_v12 }
  0xb8   : > { %2752 = vmatmul.mubr.msk.bf16.vlgmr.msra.gmra.mrb[20].mxu0 %vm236_vm2, %v2750_v9  ;;  %v1032_v35 = vsel %vm240_vm1, %v1011_v32, 0 }
  0xb9   : > { %854 = vmatpush1.bf16.msra.mxu0 %v757_v10  ;;  %885 = vmatprep.mubr.bf16.mxu0 %v2935_v0 }
  0xba   : > { %2852 = vmatprep.subr.bf16.mxu0 %v2943_v37  ;;  %v999_v15 = vpop.permute.xlu0 %998  ;;  %v1001_v16 = vpop.permute.xlu1 %1000 }
  0xbb   : > { %v1012_v28 = vsel %vm1006_vm5, %v997_v12, %v999_v15  ;;  %v1013_v39 = vsel %vm1006_vm5, %v999_v15, %v1001_v16 }
  0xbc   : > { %2754 = vmatmul.mubr.msk.bf16.vlgmr.msra.gmra.mrb[20].mxu1 %vm236_vm2, %v2750_v9  ;;  %v1038_v40 = vsel %vm240_vm1, %v1013_v39, 0 }
  0xbd   : > { %895 = vmatpush1.bf16.msra.mxu1 %v763_v14  ;;  %926 = vmatprep.mubr.bf16.mxu1 %v2935_v0 }
  0xbe   : > { %2761 = vmatprep.subr.msk.bf16.mxu1 %vm240_vm1, %v1008_v18  ;;  %v1003_v20 = vpop.permute.xlu0 %1002  ;;  %v1005_v21 = vpop.permute.xlu1 %1004 }
  0xbf   : > { %v1014_v33 = vsel %vm1006_vm5, %v1001_v16, %v1003_v20  ;;  %v1015_v43 = vsel %vm1006_vm5, %v1003_v20, %v1005_v21 }
  0xc0   : > { %2756 = vmatmul.mubr.msk.bf16.vlgmr.msra.gmra.mrb[24].mxu0 %vm236_vm2, %v2750_v9  ;;  %v1044_v45 = vsel %vm240_vm1, %v1015_v43, 0 }
  0xc1   : > { %2853 = vmatpush3.bf16.msra.mxu0 %v769_v19  ;;  %2854 = vmatprep.mubr.msk.bf16.mxu0 %vm2944_vm3, %v2943_v37 }
  0xc2   : > { %2763 = vmatprep.subr.msk.bf16.mxu0 %vm240_vm1, %v1010_v23  ;;  %v1262_v25 = vpop.permute.xlu0 %1261  ;;  %v1264_v26 = vpop.permute.xlu1 %1263 }
  0xc3   : > { %v1282_v48 = vsel %vm1281_vm6, %v1262_v25, %v1264_v26 }
  0xc4   : > { %2758 = vmatmul.mubr.msk.bf16.vlgmr.msra.gmra.mrb[24].mxu1 %vm236_vm2, %v2750_v9  ;;  %v1295_v50 = vsel %vm240_vm1, %v1282_v48, 0  ;;  %v2790_v48 = vld [vmem:[%s3427_s1 + $0x18] sm:$0xf] }
  0xc5   : > { %1047 = vmatpush1.bf16.msra.mxu1 %v1020_v24  ;;  %1078 = vmatprep.mubr.bf16.mxu1 %v2935_v0 }
  0xc6   : > { %2765 = vmatprep.subr.msk.bf16.mxu1 %vm240_vm1, %v1012_v28  ;;  %v1266_v30 = vpop.permute.xlu0 %1265  ;;  %v1268_v31 = vpop.permute.xlu1 %1267 }
  0xc7   : > { %v1283_v44 = vsel %vm1281_vm6, %v1264_v26, %v1266_v30  ;;  %v1284_v53 = vsel %vm1281_vm6, %v1266_v30, %v1268_v31 }
  0xc8   : > { %2855 = vmatmul.mubr.msk.bf16.vlgmr.msra.gmra.mrb[28].mxu0 %vm236_vm2, %v2750_v9  ;;  %v1301_v55 = vsel %vm240_vm1, %v1284_v53, 0 }
  0xc9   : > { %1088 = vmatpush1.bf16.msra.mxu0 %v1026_v29  ;;  %1119 = vmatprep.mubr.bf16.mxu0 %v2935_v0 }
  0xca   : > { %2767 = vmatprep.subr.msk.bf16.mxu0 %vm240_vm1, %v1014_v33  ;;  %v1270_v36 = vpop.permute.xlu0 %1269  ;;  %v1272_v38 = vpop.permute.xlu1 %1271 }
  0xcb   : > { %v1285_v49 = vsel %vm1281_vm6, %v1268_v31, %v1270_v36  ;;  %v1286_v58 = vsel %vm1281_vm6, %v1270_v36, %v1272_v38 }
  0xcc   : > { %2762 = vmatmul.mubr.msk.bf16.vlgmr.msra.gmra.mrb[28].mxu1 %vm236_vm2, %v2760_v34  ;;  %v1307_v61 = vsel %vm240_vm1, %v1286_v58, 0 }
  0xcd   : > { %1129 = vmatpush1.bf16.msra.mxu1 %v1032_v35  ;;  %1160 = vmatprep.mubr.bf16.mxu1 %v2935_v0 }
  0xce   : > { %2858 = vmatprep.subr.bf16.mxu1 %v2943_v37  ;;  %v1274_v41 = vpop.permute.xlu0 %1273  ;;  %v1276_v42 = vpop.permute.xlu1 %1275 }
  0xcf   : > { %v1287_v54 = vsel %vm1281_vm6, %v1272_v38, %v1274_v41  ;;  %v1288_v1 = vsel %vm1281_vm6, %v1274_v41, %v1276_v42 }
  0xd0   : > { %2764 = vmatmul.mubr.msk.bf16.vlgmr.msra.gmra.mrb[32].mxu0 %vm236_vm2, %v2760_v34  ;;  %v1313_v2 = vsel %vm240_vm1, %v1288_v1, 0 }
  0xd1   : > { %1170 = vmatpush1.bf16.msra.mxu0 %v1038_v40  ;;  %1201 = vmatprep.mubr.bf16.mxu0 %v2935_v0 }
  0xd2   : > { %2771 = vmatprep.subr.msk.bf16.mxu0 %vm240_vm1, %v1283_v44  ;;  %v1278_v46 = vpop.permute.xlu0 %1277  ;;  %v1280_v47 = vpop.permute.xlu1 %1279 }
  0xd3   : > { %v1289_v59 = vsel %vm1281_vm6, %v1276_v42, %v1278_v46  ;;  %v1290_v5 = vsel %vm1281_vm6, %v1278_v46, %v1280_v47 }
  0xd4   : > { %2766 = vmatmul.mubr.msk.bf16.vlgmr.msra.gmra.mrb[32].mxu1 %vm236_vm2, %v2760_v34  ;;  %v1319_v7 = vsel %vm240_vm1, %v1290_v5, 0 }
  0xd5   : > { %2859 = vmatpush3.bf16.msra.mxu1 %v1044_v45  ;;  %2860 = vmatprep.mubr.msk.bf16.mxu1 %vm2944_vm3, %v2943_v37 }
  0xd6   : > { %2773 = vmatprep.subr.msk.bf16.mxu1 %vm240_vm1, %v1285_v49  ;;  %v1537_v51 = vpop.permute.xlu0 %1536  ;;  %v1539_v52 = vpop.permute.xlu1 %1538  ;;  %v2634_v49 = vld [vmem:[%s3428_s2] sm:$0xff] }
  0xd7   : > { %v1557_v10 = vsel %vm1556_vm7, %v1537_v51, %v1539_v52  ;;  %2637 = vperm.xlu0 %2915, %v2634_v49  }
  0xd8   : > { %2768 = vmatmul.mubr.msk.bf16.vlgmr.msra.gmra.mrb[36].mxu0 %vm236_vm2, %v2760_v34  ;;  %v1570_v12 = vsel %vm240_vm1, %v1557_v10, 0 }
  0xd9   : > { %1322 = vmatpush1.bf16.msra.mxu0 %v1295_v50  ;;  %1353 = vmatprep.mubr.bf16.mxu0 %v2935_v0 }
  0xda   : > { %2775 = vmatprep.subr.msk.bf16.mxu0 %vm240_vm1, %v1287_v54  ;;  %v1541_v56 = vpop.permute.xlu0 %1540  ;;  %v1543_v57 = vpop.permute.xlu1 %1542 }
  0xdb   : > { %v1558_v6 = vsel %vm1556_vm7, %v1539_v52, %v1541_v56  ;;  %v1559_v15 = vsel %vm1556_vm7, %v1541_v56, %v1543_v57 }
  0xdc   : > { %2861 = vmatmul.mubr.msk.bf16.vlgmr.msra.gmra.mrb[36].mxu1 %vm236_vm2, %v2760_v34  ;;  %v1576_v17 = vsel %vm240_vm1, %v1559_v15, 0 }
  0xdd   : > { %1363 = vmatpush1.bf16.msra.mxu1 %v1301_v55  ;;  %1394 = vmatprep.mubr.bf16.mxu1 %v2935_v0 }
  0xde   : > { %2777 = vmatprep.subr.msk.bf16.mxu1 %vm240_vm1, %v1289_v59  ;;  %v1545_v62 = vpop.permute.xlu0 %1544  ;;  %v1547_v63 = vpop.permute.xlu1 %1546 }
  0xdf   : > { %v1560_v11 = vsel %vm1556_vm7, %v1543_v57, %v1545_v62  ;;  %v1561_v20 = vsel %vm1556_vm7, %v1545_v62, %v1547_v63 }
  0xe0   : > { %2772 = vmatmul.mubr.msk.bf16.vlgmr.msra.gmra.mrb[40].mxu0 %vm236_vm2, %v2770_v60  ;;  %v1582_v23 = vsel %vm240_vm1, %v1561_v20, 0 }
  0xe1   : > { %1404 = vmatpush1.bf16.msra.mxu0 %v1307_v61  ;;  %1435 = vmatprep.mubr.bf16.mxu0 %v2935_v0 }
  0xe2   : > { %2864 = vmatprep.subr.bf16.mxu0 %v2943_v37  ;;  %v1549_v3 = vpop.permute.xlu0 %1548  ;;  %v1551_v4 = vpop.permute.xlu1 %1550 }
  0xe3   : > { %v1562_v16 = vsel %vm1556_vm7, %v1547_v63, %v1549_v3  ;;  %v1563_v26 = vsel %vm1556_vm7, %v1549_v3, %v1551_v4 }
  0xe4   : > { %2774 = vmatmul.mubr.msk.bf16.vlgmr.msra.gmra.mrb[40].mxu1 %vm236_vm2, %v2770_v60  ;;  %v1588_v27 = vsel %vm240_vm1, %v1563_v26, 0 }
  0xe5   : > { %1445 = vmatpush1.bf16.msra.mxu1 %v1313_v2  ;;  %1476 = vmatprep.mubr.bf16.mxu1 %v2935_v0 }
  0xe6   : > { %2781 = vmatprep.subr.msk.bf16.mxu1 %vm240_vm1, %v1558_v6  ;;  %v1553_v8 = vpop.permute.xlu0 %1552  ;;  %v1555_v9 = vpop.permute.xlu1 %1554 }
  0xe7   : > { %v1564_v21 = vsel %vm1556_vm7, %v1551_v4, %v1553_v8  ;;  %v1565_v30 = vsel %vm1556_vm7, %v1553_v8, %v1555_v9  ;;  %v2800_v9 = vld [vmem:[%s3427_s1 + $0x1c] sm:$0xf] }
  0xe8   : > { %2776 = vmatmul.mubr.msk.bf16.vlgmr.msra.gmra.mrb[44].mxu0 %vm236_vm2, %v2770_v60  ;;  %v1594_v32 = vsel %vm240_vm1, %v1565_v30, 0 }
  0xe9   : > { %2865 = vmatpush3.bf16.msra.mxu0 %v1319_v7  ;;  %2866 = vmatprep.mubr.msk.bf16.mxu0 %vm2944_vm3, %v2943_v37 }
  0xea   : > { %2783 = vmatprep.subr.msk.bf16.mxu0 %vm240_vm1, %v1560_v11  ;;  %v1812_v13 = vpop.permute.xlu0 %1811  ;;  %v1814_v14 = vpop.permute.xlu1 %1813 }
  0xeb   : > { %v1832_v35 = vsel %vm1831_vm8, %v1812_v13, %v1814_v14 }
  0xec   : > { %2778 = vmatmul.mubr.msk.bf16.vlgmr.msra.gmra.mrb[44].mxu1 %vm236_vm2, %v2770_v60  ;;  %v1845_v38 = vsel %vm240_vm1, %v1832_v35, 0 }
  0xed   : > { %1597 = vmatpush1.bf16.msra.mxu1 %v1570_v12  ;;  %1628 = vmatprep.mubr.bf16.mxu1 %v2935_v0 }
  0xee   : > { %2785 = vmatprep.subr.msk.bf16.mxu1 %vm240_vm1, %v1562_v16  ;;  %v1816_v18 = vpop.permute.xlu0 %1815  ;;  %v1818_v19 = vpop.permute.xlu1 %1817 }
  0xef   : > { %v1833_v31 = vsel %vm1831_vm8, %v1814_v14, %v1816_v18  ;;  %v1834_v40 = vsel %vm1831_vm8, %v1816_v18, %v1818_v19 }
  0xf0   : > { %2867 = vmatmul.mubr.msk.bf16.vlgmr.msra.gmra.mrb[48].mxu0 %vm236_vm2, %v2770_v60  ;;  %v1851_v43 = vsel %vm240_vm1, %v1834_v40, 0 }
  0xf1   : > { %1638 = vmatpush1.bf16.msra.mxu0 %v1576_v17  ;;  %1669 = vmatprep.mubr.bf16.mxu0 %v2935_v0 }
  0xf2   : > { %2787 = vmatprep.subr.msk.bf16.mxu0 %vm240_vm1, %v1564_v21  ;;  %v1820_v24 = vpop.permute.xlu0 %1819  ;;  %v1822_v25 = vpop.permute.xlu1 %1821 }
  0xf3   : > { %v1835_v36 = vsel %vm1831_vm8, %v1818_v19, %v1820_v24  ;;  %v1836_v44 = vsel %vm1831_vm8, %v1820_v24, %v1822_v25 }
  0xf4   : > { %2782 = vmatmul.mubr.msk.bf16.vlgmr.msra.gmra.mrb[48].mxu1 %vm236_vm2, %v2780_v22  ;;  %v1857_v50 = vsel %vm240_vm1, %v1836_v44, 0 }
  0xf5   : > { %1679 = vmatpush1.bf16.msra.mxu1 %v1582_v23  ;;  %1710 = vmatprep.mubr.bf16.mxu1 %v2935_v0 }
  0xf6   : > { %2870 = vmatprep.subr.bf16.mxu1 %v2943_v37  ;;  %v1824_v28 = vpop.permute.xlu0 %1823  ;;  %v1826_v29 = vpop.permute.xlu1 %1825 }
  0xf7   : > { %v1837_v41 = vsel %vm1831_vm8, %v1822_v25, %v1824_v28  ;;  %v1838_v51 = vsel %vm1831_vm8, %v1824_v28, %v1826_v29 }
  0xf8   : > { %2784 = vmatmul.mubr.msk.bf16.vlgmr.msra.gmra.mrb[52].mxu0 %vm236_vm2, %v2780_v22  ;;  %v1863_v54 = vsel %vm240_vm1, %v1838_v51, 0 }
  0xf9   : > { %1720 = vmatpush1.bf16.msra.mxu0 %v1588_v27  ;;  %1751 = vmatprep.mubr.bf16.mxu0 %v2935_v0 }
  0xfa   : > { %2791 = vmatprep.subr.msk.bf16.mxu0 %vm240_vm1, %v1833_v31  ;;  %v1828_v33 = vpop.permute.xlu0 %1827  ;;  %v1830_v34 = vpop.permute.xlu1 %1829  ;;  %v2810_v31 = vld [vmem:[%s3427_s1 + $0x20] sm:$0xf] }
  0xfb   : > { %v1839_v45 = vsel %vm1831_vm8, %v1826_v29, %v1828_v33  ;;  %v1840_v55 = vsel %vm1831_vm8, %v1828_v33, %v1830_v34 }
  0xfc   : > { %2786 = vmatmul.mubr.msk.bf16.vlgmr.msra.gmra.mrb[52].mxu1 %vm236_vm2, %v2780_v22  ;;  %v1869_v58 = vsel %vm240_vm1, %v1840_v55, 0 }
  0xfd   : > { %2871 = vmatpush3.bf16.msra.mxu1 %v1594_v32  ;;  %2872 = vmatprep.mubr.msk.bf16.mxu1 %vm2944_vm3, %v2943_v37 }
  0xfe   : > { %2793 = vmatprep.subr.msk.bf16.mxu1 %vm240_vm1, %v1835_v36  ;;  %v2087_v39 = vpop.permute.xlu0 %2086 }
  0xff   : > { %v2089_v42 = vpop.permute.xlu1 %2088 }
 0x100   : > { %2788 = vmatmul.mubr.msk.bf16.vlgmr.msra.gmra.mrb[56].mxu0 %vm236_vm2, %v2780_v22  ;;  %v2107_v60 = vsel %vm2106_vm9, %v2087_v39, %v2089_v42 }
 0x101   : > { %1872 = vmatpush1.bf16.msra.mxu0 %v1845_v38  ;;  %1903 = vmatprep.mubr.bf16.mxu0 %v2935_v0  ;;  %v2120_v63 = vsel %vm240_vm1, %v2107_v60, 0 }
 0x102   : > { %2795 = vmatprep.subr.msk.bf16.mxu0 %vm240_vm1, %v1837_v41 }
 0x104   : > { %2873 = vmatmul.mubr.msk.bf16.vlgmr.msra.gmra.mrb[56].mxu1 %vm236_vm2, %v2780_v22  ;;  %v2091_v46 = vpop.permute.xlu0 %2090  ;;  %v2093_v47 = vpop.permute.xlu1 %2092 }
 0x105   : > { %1913 = vmatpush1.bf16.msra.mxu1 %v1851_v43  ;;  %1944 = vmatprep.mubr.bf16.mxu1 %v2935_v0  ;;  %v2108_v56 = vsel %vm2106_vm9, %v2089_v42, %v2091_v46  ;;  %v2109_v2 = vsel %vm2106_vm9, %v2091_v46, %v2093_v47 }
 0x106   : > { %2797 = vmatprep.subr.msk.bf16.mxu1 %vm240_vm1, %v1839_v45  ;;  %v2126_v5 = vsel %vm240_vm1, %v2109_v2, 0 }
 0x108   : > { %2792 = vmatmul.mubr.msk.bf16.vlgmr.msra.gmra.mrb[60].mxu0 %vm236_vm2, %v2790_v48  ;;  %v2095_v52 = vpop.permute.xlu0 %2094 }
 0x109   : > { %1954 = vmatpush1.bf16.msra.mxu0 %v1857_v50  ;;  %1985 = vmatprep.mubr.bf16.mxu0 %v2935_v0  ;;  %v2097_v53 = vpop.permute.xlu1 %2096  ;;  %v2110_v61 = vsel %vm2106_vm9, %v2093_v47, %v2095_v52 }
 0x10a   : > { %2876 = vmatprep.subr.bf16.mxu0 %v2943_v37  ;;  %v2111_v7 = vsel %vm2106_vm9, %v2095_v52, %v2097_v53 }
 0x10b   : > { %v2132_v11 = vsel %vm240_vm1, %v2111_v7, 0 }
 0x10c   : > { %2794 = vmatmul.mubr.msk.bf16.vlgmr.msra.gmra.mrb[60].mxu1 %vm236_vm2, %v2790_v48 }
 0x10d   : > { %1995 = vmatpush1.bf16.msra.mxu1 %v1863_v54  ;;  %2026 = vmatprep.mubr.bf16.mxu1 %v2935_v0  ;;  %v2099_v57 = vpop.permute.xlu0 %2098 }
 0x10e   : > { %2801 = vmatprep.subr.msk.bf16.mxu1 %vm240_vm1, %v2108_v56  ;;  %v2101_v59 = vpop.permute.xlu1 %2100  ;;  %v2112_v3 = vsel %vm2106_vm9, %v2097_v53, %v2099_v57 }
 0x10f   : > { %v2113_v12 = vsel %vm2106_vm9, %v2099_v57, %v2101_v59 }
 0x110   : > { %2796 = vmatmul.mubr.msk.bf16.vlgmr.msra.gmra.mrb[64].mxu0 %vm236_vm2, %v2790_v48  ;;  %v2138_v15 = vsel %vm240_vm1, %v2113_v12, 0 }
 0x111   : > { %2877 = vmatpush3.bf16.msra.mxu0 %v1869_v58  ;;  %2878 = vmatprep.mubr.msk.bf16.mxu0 %vm2944_vm3, %v2943_v37  ;;  %v2103_v62 = vpop.permute.xlu0 %2102 }
 0x112   : > { %2803 = vmatprep.subr.msk.bf16.mxu0 %vm240_vm1, %v2110_v61  ;;  %v2105_v1 = vpop.permute.xlu1 %2104  ;;  %v2114_v8 = vsel %vm2106_vm9, %v2101_v59, %v2103_v62 }
 0x113   : > { %v2115_v16 = vsel %vm2106_vm9, %v2103_v62, %v2105_v1 }
 0x114   : > { %2798 = vmatmul.mubr.msk.bf16.vlgmr.msra.gmra.mrb[64].mxu1 %vm236_vm2, %v2790_v48  ;;  %v2144_v18 = vsel %vm240_vm1, %v2115_v16, 0 }
 0x115   : > { %2147 = vmatpush1.bf16.msra.mxu1 %v2120_v63  ;;  %2178 = vmatprep.mubr.bf16.mxu1 %v2935_v0  ;;  %v2362_v4 = vpop.permute.xlu0 %2361 }
 0x116   : > { %2805 = vmatprep.subr.msk.bf16.mxu1 %vm240_vm1, %v2112_v3  ;;  %v2364_v6 = vpop.permute.xlu1 %2363 }
 0x117   : > { %v2382_v21 = vsel %vm2381_vm10, %v2362_v4, %v2364_v6 }
 0x118   : > { %2879 = vmatmul.mubr.msk.bf16.vlgmr.msra.gmra.mrb[68].mxu0 %vm236_vm2, %v2790_v48  ;;  %v2395_v23 = vsel %vm240_vm1, %v2382_v21, 0 }
 0x119   : > { %2188 = vmatpush1.bf16.msra.mxu0 %v2126_v5  ;;  %2219 = vmatprep.mubr.bf16.mxu0 %v2935_v0  ;;  %v2366_v10 = vpop.permute.xlu0 %2365 }
 0x11a   : > { %2807 = vmatprep.subr.msk.bf16.mxu0 %vm240_vm1, %v2114_v8  ;;  %v2368_v13 = vpop.permute.xlu1 %2367  ;;  %v2383_v17 = vsel %vm2381_vm10, %v2364_v6, %v2366_v10 }
 0x11b   : > { %v2384_v24 = vsel %vm2381_vm10, %v2366_v10, %v2368_v13 }
 0x11c   : > { %2802 = vmatmul.mubr.msk.bf16.vlgmr.msra.gmra.mrb[68].mxu1 %vm236_vm2, %v2800_v9  ;;  %v2401_v28 = vsel %vm240_vm1, %v2384_v24, 0 }
 0x11d   : > { %2229 = vmatpush1.bf16.msra.mxu1 %v2132_v11  ;;  %2260 = vmatprep.mubr.bf16.mxu1 %v2935_v0  ;;  %v2370_v14 = vpop.permute.xlu0 %2369 }
 0x11e   : > { %2882 = vmatprep.subr.bf16.mxu1 %v2943_v37  ;;  %v2372_v19 = vpop.permute.xlu1 %2371  ;;  %v2385_v22 = vsel %vm2381_vm10, %v2368_v13, %v2370_v14 }
 0x11f   : > { %v2386_v29 = vsel %vm2381_vm10, %v2370_v14, %v2372_v19 }
 0x120   : > { %2804 = vmatmul.mubr.msk.bf16.vlgmr.msra.gmra.mrb[72].mxu0 %vm236_vm2, %v2800_v9  ;;  %v2407_v32 = vsel %vm240_vm1, %v2386_v29, 0 }
 0x121   : > { %2270 = vmatpush1.bf16.msra.mxu0 %v2138_v15  ;;  %2301 = vmatprep.mubr.bf16.mxu0 %v2935_v0  ;;  %v2374_v20 = vpop.permute.xlu0 %2373 }
 0x122   : > { %2811 = vmatprep.subr.msk.bf16.mxu0 %vm240_vm1, %v2383_v17  ;;  %v2387_v25 = vsel %vm2381_vm10, %v2372_v19, %v2374_v20  ;;  %v2376_v26 = vpop.permute.xlu1 %2375 }
 0x123   : > { %v2388_v33 = vsel %vm2381_vm10, %v2374_v20, %v2376_v26 }
 0x124   : > { %2806 = vmatmul.mubr.msk.bf16.vlgmr.msra.gmra.mrb[72].mxu1 %vm236_vm2, %v2800_v9  ;;  %v2413_v35 = vsel %vm240_vm1, %v2388_v33, 0 }
 0x125   : > { %2883 = vmatpush3.bf16.msra.mxu1 %v2144_v18  ;;  %2884 = vmatprep.mubr.msk.bf16.mxu1 %vm2944_vm3, %v2943_v37  ;;  %v2378_v27 = vpop.permute.xlu0 %2377 }
 0x126   : > { %2813 = vmatprep.subr.msk.bf16.mxu1 %vm240_vm1, %v2385_v22  ;;  %v2389_v30 = vsel %vm2381_vm10, %v2376_v26, %v2378_v27  ;;  %v2380_v34 = vpop.permute.xlu1 %2379 }
 0x127   : > { %v2390_v36 = vsel %vm2381_vm10, %v2378_v27, %v2380_v34 }
 0x128   : > { %2808 = vmatmul.mubr.msk.bf16.vlgmr.msra.gmra.mrb[76].mxu0 %vm236_vm2, %v2800_v9  ;;  %v2419_v38 = vsel %vm240_vm1, %v2390_v36, 0 }
 0x129   : > { %2422 = vmatpush1.bf16.msra.mxu0 %v2395_v23  ;;  %2453 = vmatprep.mubr.bf16.mxu0 %v2935_v0 }
 0x12a   : > { %2815 = vmatprep.subr.msk.bf16.mxu0 %vm240_vm1, %v2387_v25 }
 0x12c   : > { %2885 = vmatmul.mubr.msk.bf16.vlgmr.msra.gmra.mrb[76].mxu1 %vm236_vm2, %v2800_v9 }
 0x12d   : > { %2463 = vmatpush1.bf16.msra.mxu1 %v2401_v28  ;;  %2494 = vmatprep.mubr.bf16.mxu1 %v2935_v0 }
 0x12e   : > { %2817 = vmatprep.subr.msk.bf16.mxu1 %vm240_vm1, %v2389_v30 }
 0x130   : > { %2812 = vmatmul.mubr.msk.bf16.vlgmr.msra.gmra.mrb[80].mxu0 %vm236_vm2, %v2810_v31 }
 0x131   : > { %2504 = vmatpush1.bf16.msra.mxu0 %v2407_v32  ;;  %2535 = vmatprep.mubr.bf16.mxu0 %v2935_v0 }
 0x132   : > { %2888 = vmatprep.subr.bf16.mxu0 %v2943_v37 }
 0x134   : > { %2814 = vmatmul.mubr.msk.bf16.vlgmr.msra.gmra.mrb[80].mxu1 %vm236_vm2, %v2810_v31 }
 0x135   : > { %2545 = vmatpush1.bf16.msra.mxu1 %v2413_v35  ;;  %2576 = vmatprep.mubr.bf16.mxu1 %v2935_v0 }
 0x138   : > { %2816 = vmatmul.mubr.msk.bf16.vlgmr.msra.gmra.mrb[84].mxu0 %vm236_vm2, %v2810_v31 }
 0x139   : > { %2889 = vmatpush3.bf16.msra.mxu0 %v2419_v38  ;;  %2890 = vmatprep.mubr.msk.bf16.mxu0 %vm2944_vm3, %v2943_v37 }
 0x13c   : > { %2818 = vmatmul.mubr.msk.bf16.vlgmr.msra.gmra.mrb[84].mxu1 %vm236_vm2, %v2810_v31 }
 0x140   : > { %2891 = vmatmul.mubr.msk.bf16.vlgmr.msra.gmra.mrb[88].mxu0 %vm236_vm2, %v2810_v31 }
 0x163   : > { %v302_v39 = vpop.f32.mrb[0].mxu0 }
 0x164   : > { %v304_v40 = vpop.f32.mrb[1].mxu0 }
 0x165   : > { %v306_v41 = vpop.f32.mrb[2].mxu0 }
 0x166   : > { %v307_v42 = vpop.f32.mrb[3].mxu0 }
 0x167   : > { %v343_v43 = vpop.f32.mrb[0].mxu1 }
 0x168   : > { %v345_v44 = vpop.f32.mrb[1].mxu1 }
 0x169   : > { %v347_v45 = vpop.f32.mrb[2].mxu1 }
 0x16a   : > { %v348_v0 = vpop.f32.mrb[3].mxu1 }
 0x16b   : > { %v384_v46 = vpop.f32.mrb[4].mxu0 }
 0x16c   : > { %v386_v47 = vpop.f32.mrb[5].mxu0 }
 0x16d   : > { %v388_v48 = vpop.f32.mrb[6].mxu0 }
 0x16e   : > { %v389_v49 = vpop.f32.mrb[7].mxu0 }
 0x16f   : > { %v425_v50 = vpop.f32.mrb[4].mxu1 }
 0x170   : > { %v427_v51 = vpop.f32.mrb[5].mxu1 }
 0x171   : > { %v429_v52 = vpop.f32.mrb[6].mxu1 }
 0x172   : > { %v430_v37 = vpop.f32.mrb[7].mxu1 }
 0x173   : > { %v466_v53 = vpop.f32.mrb[8].mxu0 }
 0x174   : > { %v2844_v54 = vpop.f32.mrb[9].mxu0 }
 0x175   : > { %v469_v55 = vpop.f32.mrb[10].mxu0 }
 0x176   : > { %v2845_v56 = vpop.f32.mrb[11].mxu0 }
 0x177   : > { %v539_v57 = vpop.f32.mrb[8].mxu1 }
 0x178   : > { %v540_v58 = vadd.f32 %v539_v57, %v302_v39  ;;  %v541_v59 = vpop.f32.mrb[9].mxu1 }
 0x179   : > { %v542_v60 = vadd.f32 %v541_v59, %v304_v40  ;;  %v543_v61 = vpop.f32.mrb[10].mxu1 }
 0x17a   : > { %v544_v62 = vpop.f32.mrb[11].mxu1 }
 0x17b   : > { %v580_v63 = vpop.f32.mrb[12].mxu0 }
 0x17c   : > { %v581_v1 = vadd.f32 %v580_v63, %v343_v43  ;;  %v582_v2 = vpop.f32.mrb[13].mxu0 }
 0x17d   : > { %v583_v3 = vadd.f32 %v582_v2, %v345_v44  ;;  %v584_v4 = vpop.f32.mrb[14].mxu0 }
 0x17e   : > { %v585_v5 = vpop.f32.mrb[15].mxu0 }
 0x17f   : > { %v621_v6 = vpop.f32.mrb[12].mxu1 }
 0x180   : > { %v622_v7 = vadd.f32 %v621_v6, %v384_v46  ;;  %v623_v8 = vpop.f32.mrb[13].mxu1 }
 0x181   : > { %v624_v9 = vadd.f32 %v623_v8, %v386_v47  ;;  %v625_v10 = vpop.f32.mrb[14].mxu1 }
 0x182   : > { %v626_v11 = vpop.f32.mrb[15].mxu1 }
 0x183   : > { %v662_v12 = vpop.f32.mrb[16].mxu0 }
 0x184   : > { %v663_v13 = vadd.f32 %v662_v12, %v425_v50  ;;  %v664_v14 = vpop.f32.mrb[17].mxu0 }
 0x185   : > { %v665_v15 = vadd.f32 %v664_v14, %v427_v51  ;;  %v666_v16 = vpop.f32.mrb[18].mxu0 }
 0x186   : > { %v667_v17 = vpop.f32.mrb[19].mxu0 }
 0x187   : > { %v703_v18 = vpop.f32.mrb[16].mxu1 }
 0x188   : > { %v704_v19 = vadd.f32 %v703_v18, %v466_v53  ;;  %v2850_v20 = vpop.f32.mrb[17].mxu1 }
 0x189   : > { %v706_v21 = vpop.f32.mrb[18].mxu1 }
 0x18a   : > { %v2851_v22 = vpop.f32.mrb[19].mxu1 }
 0x18b   : > { %v805_v23 = vpop.f32.mrb[20].mxu0 }
 0x18c   : > { %v975_v24 = vadd.f32 %v805_v23, %v540_v58  ;;  %v807_v25 = vpop.f32.mrb[21].mxu0 }
 0x18d   : > { %v976_v26 = vadd.f32 %v807_v25, %v542_v60  ;;  %v809_v27 = vpop.f32.mrb[22].mxu0 }
 0x18e   : > { %v810_v28 = vpop.f32.mrb[23].mxu0 }
 0x18f   : > { %v846_v29 = vpop.f32.mrb[20].mxu1 }
 0x190   : > { %v977_v30 = vadd.f32 %v846_v29, %v581_v1  ;;  %v848_v31 = vpop.f32.mrb[21].mxu1 }
 0x191   : > { %v978_v32 = vadd.f32 %v848_v31, %v583_v3  ;;  %v850_v33 = vpop.f32.mrb[22].mxu1 }
 0x192   : > { %v851_v34 = vpop.f32.mrb[23].mxu1 }
 0x193   : > { %v887_v35 = vpop.f32.mrb[24].mxu0 }
 0x194   : > { %v979_v36 = vadd.f32 %v887_v35, %v622_v7  ;;  %v889_v38 = vpop.f32.mrb[25].mxu0 }
 0x195   : > { %v980_v39 = vadd.f32 %v889_v38, %v624_v9  ;;  %v891_v40 = vpop.f32.mrb[26].mxu0 }
 0x196   : > { %v892_v41 = vpop.f32.mrb[27].mxu0 }
 0x197   : > { %v928_v42 = vpop.f32.mrb[24].mxu1 }
 0x198   : > { %v981_v43 = vadd.f32 %v928_v42, %v663_v13  ;;  %v930_v44 = vpop.f32.mrb[25].mxu1 }
 0x199   : > { %v982_v45 = vadd.f32 %v930_v44, %v665_v15  ;;  %v932_v0 = vpop.f32.mrb[26].mxu1 }
 0x19a   : > { %v933_v46 = vpop.f32.mrb[27].mxu1 }
 0x19b   : > { %v969_v47 = vpop.f32.mrb[28].mxu0 }
 0x19c   : > { %v983_v48 = vadd.f32 %v969_v47, %v704_v19  ;;  %v2856_v49 = vpop.f32.mrb[29].mxu0 }
 0x19d   : > { %v972_v50 = vpop.f32.mrb[30].mxu0 }
 0x19e   : > { %v2857_v51 = vpop.f32.mrb[31].mxu0 }
 0x19f   : > { %v1080_v52 = vpop.f32.mrb[28].mxu1 }
 0x1a0   : > { %v1250_v37 = vadd.f32 %v1080_v52, %v975_v24  ;;  %v1082_v53 = vpop.f32.mrb[29].mxu1 }
 0x1a1   : > { %v1251_v54 = vadd.f32 %v1082_v53, %v976_v26  ;;  %v1084_v55 = vpop.f32.mrb[30].mxu1 }
 0x1a2   : > { %v1085_v56 = vpop.f32.mrb[31].mxu1 }
 0x1a3   : > { %v1121_v57 = vpop.f32.mrb[32].mxu0 }
 0x1a4   : > { %v1252_v58 = vadd.f32 %v1121_v57, %v977_v30  ;;  %v1123_v59 = vpop.f32.mrb[33].mxu0 }
 0x1a5   : > { %v1253_v60 = vadd.f32 %v1123_v59, %v978_v32  ;;  %v1125_v61 = vpop.f32.mrb[34].mxu0 }
 0x1a6   : > { %v1126_v62 = vpop.f32.mrb[35].mxu0 }
 0x1a7   : > { %v1162_v63 = vpop.f32.mrb[32].mxu1 }
 0x1a8   : > { %v1254_v1 = vadd.f32 %v1162_v63, %v979_v36  ;;  %v1164_v2 = vpop.f32.mrb[33].mxu1 }
 0x1a9   : > { %v1255_v3 = vadd.f32 %v1164_v2, %v980_v39  ;;  %v1166_v4 = vpop.f32.mrb[34].mxu1 }
 0x1aa   : > { %v1167_v5 = vpop.f32.mrb[35].mxu1 }
 0x1ab   : > { %v1203_v6 = vpop.f32.mrb[36].mxu0 }
 0x1ac   : > { %v1256_v7 = vadd.f32 %v1203_v6, %v981_v43  ;;  %v1205_v8 = vpop.f32.mrb[37].mxu0 }
 0x1ad   : > { %v1257_v9 = vadd.f32 %v1205_v8, %v982_v45  ;;  %v1207_v10 = vpop.f32.mrb[38].mxu0 }
 0x1ae   : > { %v1208_v11 = vpop.f32.mrb[39].mxu0 }
 0x1af   : > { %v1244_v12 = vpop.f32.mrb[36].mxu1 }
 0x1b0   : > { %v1258_v13 = vadd.f32 %v1244_v12, %v983_v48  ;;  %v2862_v14 = vpop.f32.mrb[37].mxu1 }
 0x1b1   : > { %v1247_v15 = vpop.f32.mrb[38].mxu1 }
 0x1b2   : > { %v2863_v16 = vpop.f32.mrb[39].mxu1 }
 0x1b3   : > { %v1355_v17 = vpop.f32.mrb[40].mxu0 }
 0x1b4   : > { %v1525_v18 = vadd.f32 %v1355_v17, %v1250_v37  ;;  %v1357_v19 = vpop.f32.mrb[41].mxu0 }
 0x1b5   : > { %v1526_v20 = vadd.f32 %v1357_v19, %v1251_v54  ;;  %v1359_v21 = vpop.f32.mrb[42].mxu0 }
 0x1b6   : > { %v1360_v22 = vpop.f32.mrb[43].mxu0 }
 0x1b7   : > { %v1396_v23 = vpop.f32.mrb[40].mxu1 }
 0x1b8   : > { %v1527_v24 = vadd.f32 %v1396_v23, %v1252_v58  ;;  %v1398_v25 = vpop.f32.mrb[41].mxu1 }
 0x1b9   : > { %v1528_v26 = vadd.f32 %v1398_v25, %v1253_v60  ;;  %v1400_v27 = vpop.f32.mrb[42].mxu1 }
 0x1ba   : > { %v1401_v28 = vpop.f32.mrb[43].mxu1 }
 0x1bb   : > { %v1437_v29 = vpop.f32.mrb[44].mxu0 }
 0x1bc   : > { %v1529_v30 = vadd.f32 %v1437_v29, %v1254_v1  ;;  %v1439_v31 = vpop.f32.mrb[45].mxu0 }
 0x1bd   : > { %v1530_v32 = vadd.f32 %v1439_v31, %v1255_v3  ;;  %v1441_v33 = vpop.f32.mrb[46].mxu0 }
 0x1be   : > { %v1442_v34 = vpop.f32.mrb[47].mxu0 }
 0x1bf   : > { %v1478_v35 = vpop.f32.mrb[44].mxu1 }
 0x1c0   : > { %v1531_v36 = vadd.f32 %v1478_v35, %v1256_v7  ;;  %v1480_v38 = vpop.f32.mrb[45].mxu1 }
 0x1c1   : > { %v1532_v39 = vadd.f32 %v1480_v38, %v1257_v9  ;;  %v1482_v40 = vpop.f32.mrb[46].mxu1 }
 0x1c2   : > { %v1483_v41 = vpop.f32.mrb[47].mxu1 }
 0x1c3   : > { %v1519_v42 = vpop.f32.mrb[48].mxu0 }
 0x1c4   : > { %v1533_v43 = vadd.f32 %v1519_v42, %v1258_v13  ;;  %v2868_v44 = vpop.f32.mrb[49].mxu0 }
 0x1c5   : > { %v1522_v45 = vpop.f32.mrb[50].mxu0 }
 0x1c6   : > { %v2869_v0 = vpop.f32.mrb[51].mxu0 }
 0x1c7   : > { %v1630_v46 = vpop.f32.mrb[48].mxu1 }
 0x1c8   : > { %v1800_v47 = vadd.f32 %v1630_v46, %v1525_v18  ;;  %v1632_v48 = vpop.f32.mrb[49].mxu1 }
 0x1c9   : > { %v1801_v49 = vadd.f32 %v1632_v48, %v1526_v20  ;;  %v1634_v50 = vpop.f32.mrb[50].mxu1 }
 0x1ca   : > { %v1635_v51 = vpop.f32.mrb[51].mxu1 }
 0x1cb   : > { %v1671_v52 = vpop.f32.mrb[52].mxu0 }
 0x1cc   : > { %v1802_v37 = vadd.f32 %v1671_v52, %v1527_v24  ;;  %v1673_v53 = vpop.f32.mrb[53].mxu0 }
 0x1cd   : > { %v1803_v54 = vadd.f32 %v1673_v53, %v1528_v26  ;;  %v1675_v55 = vpop.f32.mrb[54].mxu0 }
 0x1ce   : > { %v1676_v56 = vpop.f32.mrb[55].mxu0 }
 0x1cf   : > { %v1712_v57 = vpop.f32.mrb[52].mxu1 }
 0x1d0   : > { %v1804_v58 = vadd.f32 %v1712_v57, %v1529_v30  ;;  %v1714_v59 = vpop.f32.mrb[53].mxu1 }
 0x1d1   : > { %v1805_v60 = vadd.f32 %v1714_v59, %v1530_v32  ;;  %v1716_v61 = vpop.f32.mrb[54].mxu1 }
 0x1d2   : > { %v1717_v62 = vpop.f32.mrb[55].mxu1 }
 0x1d3   : > { %v1753_v63 = vpop.f32.mrb[56].mxu0 }
 0x1d4   : > { %v1806_v1 = vadd.f32 %v1753_v63, %v1531_v36  ;;  %v1755_v2 = vpop.f32.mrb[57].mxu0 }
 0x1d5   : > { %v1807_v3 = vadd.f32 %v1755_v2, %v1532_v39  ;;  %v1757_v4 = vpop.f32.mrb[58].mxu0 }
 0x1d6   : > { %v1758_v5 = vpop.f32.mrb[59].mxu0 }
 0x1d7   : > { %v1794_v6 = vpop.f32.mrb[56].mxu1 }
 0x1d8   : > { %v1808_v7 = vadd.f32 %v1794_v6, %v1533_v43  ;;  %v2874_v8 = vpop.f32.mrb[57].mxu1  ;;  %v2638_v6 = vpop.permute.xlu0 %2637 }
 0x1d9   : > { %v1797_v9 = vpop.f32.mrb[58].mxu1 }
 0x1da   : > { %v2875_v10 = vpop.f32.mrb[59].mxu1 }
 0x1db   : > { %v1905_v11 = vpop.f32.mrb[60].mxu0 }
 0x1dc   : > { %v2075_v12 = vadd.f32 %v1905_v11, %v1800_v47  ;;  %v1907_v13 = vpop.f32.mrb[61].mxu0 }
 0x1dd   : > { %v2076_v14 = vadd.f32 %v1907_v13, %v1801_v49  ;;  %v1909_v15 = vpop.f32.mrb[62].mxu0 }
 0x1de   : > { %v1910_v16 = vpop.f32.mrb[63].mxu0 }
 0x1df   : > { %v1946_v17 = vpop.f32.mrb[60].mxu1 }
 0x1e0   : > { %v2077_v18 = vadd.f32 %v1946_v17, %v1802_v37  ;;  %v1948_v19 = vpop.f32.mrb[61].mxu1 }
 0x1e1   : > { %v2078_v20 = vadd.f32 %v1948_v19, %v1803_v54  ;;  %v1950_v21 = vpop.f32.mrb[62].mxu1 }
 0x1e2   : > { %v1951_v22 = vpop.f32.mrb[63].mxu1 }
 0x1e3   : > { %v1987_v23 = vpop.f32.mrb[64].mxu0 }
 0x1e4   : > { %v2079_v24 = vadd.f32 %v1987_v23, %v1804_v58  ;;  %v1989_v25 = vpop.f32.mrb[65].mxu0 }
 0x1e5   : > { %v2080_v26 = vadd.f32 %v1989_v25, %v1805_v60  ;;  %v1991_v27 = vpop.f32.mrb[66].mxu0 }
 0x1e6   : > { %v1992_v28 = vpop.f32.mrb[67].mxu0 }
 0x1e7   : > { %v2028_v29 = vpop.f32.mrb[64].mxu1 }
 0x1e8   : > { %v2081_v30 = vadd.f32 %v2028_v29, %v1806_v1  ;;  %v2030_v31 = vpop.f32.mrb[65].mxu1 }
 0x1e9   : > { %v2082_v32 = vadd.f32 %v2030_v31, %v1807_v3  ;;  %v2032_v33 = vpop.f32.mrb[66].mxu1 }
 0x1ea   : > { %v2033_v34 = vpop.f32.mrb[67].mxu1 }
 0x1eb   : > { %v2069_v35 = vpop.f32.mrb[68].mxu0 }
 0x1ec   : > { %v2083_v36 = vadd.f32 %v2069_v35, %v1808_v7  ;;  %v2880_v38 = vpop.f32.mrb[69].mxu0 }
 0x1ed   : > { %v2072_v39 = vpop.f32.mrb[70].mxu0 }
 0x1ee   : > { %v2881_v40 = vpop.f32.mrb[71].mxu0 }
 0x1ef   : > { %v2180_v41 = vpop.f32.mrb[68].mxu1 }
 0x1f0   : > { %v2350_v42 = vadd.f32 %v2180_v41, %v2075_v12  ;;  %v2182_v43 = vpop.f32.mrb[69].mxu1 }
 0x1f1   : > { %v2351_v44 = vadd.f32 %v2182_v43, %v2076_v14  ;;  %v2184_v45 = vpop.f32.mrb[70].mxu1 }
 0x1f2   : > { %v2185_v0 = vpop.f32.mrb[71].mxu1 }
 0x1f3   : > { %v2221_v46 = vpop.f32.mrb[72].mxu0 }
 0x1f4   : > { %v2352_v47 = vadd.f32 %v2221_v46, %v2077_v18  ;;  %v2223_v48 = vpop.f32.mrb[73].mxu0 }
 0x1f5   : > { %v2353_v49 = vadd.f32 %v2223_v48, %v2078_v20  ;;  %v2225_v50 = vpop.f32.mrb[74].mxu0 }
 0x1f6   : > { %v2226_v51 = vpop.f32.mrb[75].mxu0 }
 0x1f7   : > { %v2262_v52 = vpop.f32.mrb[72].mxu1 }
 0x1f8   : > { %v2354_v37 = vadd.f32 %v2262_v52, %v2079_v24  ;;  %v2264_v53 = vpop.f32.mrb[73].mxu1 }
 0x1f9   : > { %v2355_v54 = vadd.f32 %v2264_v53, %v2080_v26  ;;  %v2266_v55 = vpop.f32.mrb[74].mxu1 }
 0x1fa   : > { %v2267_v56 = vpop.f32.mrb[75].mxu1 }
 0x1fb   : > { %v2303_v57 = vpop.f32.mrb[76].mxu0 }
 0x1fc   : > { %v2356_v58 = vadd.f32 %v2303_v57, %v2081_v30  ;;  %v2305_v59 = vpop.f32.mrb[77].mxu0 }
 0x1fd   : > { %v2357_v60 = vadd.f32 %v2305_v59, %v2082_v32  ;;  %v2307_v61 = vpop.f32.mrb[78].mxu0 }
 0x1fe   : > { %v2308_v62 = vpop.f32.mrb[79].mxu0 }
 0x1ff   : > { %v2344_v63 = vpop.f32.mrb[76].mxu1 }
 0x200   : > { %v2358_v1 = vadd.f32 %v2344_v63, %v2083_v36  ;;  %v2886_v2 = vpop.f32.mrb[77].mxu1 }
 0x201   : > { %v2347_v3 = vpop.f32.mrb[78].mxu1 }
 0x202   : > { %v2887_v4 = vpop.f32.mrb[79].mxu1 }
 0x203   : > { %v2455_v5 = vpop.f32.mrb[80].mxu0 }
 0x204   : > { %v2625_v7 = vadd.f32 %v2455_v5, %v2350_v42  ;;  %v2457_v8 = vpop.f32.mrb[81].mxu0 }
 0x205   : > { %v2626_v9 = vadd.f32 %v2457_v8, %v2351_v44  ;;  %v2459_v10 = vpop.f32.mrb[82].mxu0 }
 0x206   : > { %v2640_v11 = vadd.f32 %v2638_v6, %v2625_v7  ;;  %v2460_v12 = vpop.f32.mrb[83].mxu0 }
 0x207   : > { %v2641_v13 = vadd.f32 %v2638_v6, %v2626_v9  ;;  %v2496_v14 = vpop.f32.mrb[80].mxu1 }
 0x208   : > { %2649 = vst [vmem:[%s3412_s24] sm:$0xff] %v2640_v11  ;;  %v2627_v15 = vadd.f32 %v2496_v14, %v2352_v47  ;;  %v2498_v16 = vpop.f32.mrb[81].mxu1 }
 0x209   : > { %2650 = vst [vmem:[%s3412_s24 + $0x8] sm:$0xff] %v2641_v13  ;;  %v2628_v17 = vadd.f32 %v2498_v16, %v2353_v49  ;;  %v2500_v18 = vpop.f32.mrb[82].mxu1 }
 0x20a   : > { %v2642_v19 = vadd.f32 %v2638_v6, %v2627_v15  ;;  %v2501_v20 = vpop.f32.mrb[83].mxu1 }
 0x20b   : > { %v2643_v21 = vadd.f32 %v2638_v6, %v2628_v17  ;;  %v2537_v22 = vpop.f32.mrb[84].mxu0 }
 0x20c   : > { %2651 = vst [vmem:[%s3412_s24 + $0x10] sm:$0xff] %v2642_v19  ;;  %v2629_v23 = vadd.f32 %v2537_v22, %v2354_v37  ;;  %v2539_v24 = vpop.f32.mrb[85].mxu0 }
 0x20d   : > { %2652 = vst [vmem:[%s3412_s24 + $0x18] sm:$0xff] %v2643_v21  ;;  %v2630_v25 = vadd.f32 %v2539_v24, %v2355_v54  ;;  %v2541_v26 = vpop.f32.mrb[86].mxu0 }
 0x20e   : > { %v2644_v27 = vadd.f32 %v2638_v6, %v2629_v23  ;;  %v2542_v28 = vpop.f32.mrb[87].mxu0 }
 0x20f   : > { %v2645_v29 = vadd.f32 %v2638_v6, %v2630_v25  ;;  %v2578_v30 = vpop.f32.mrb[84].mxu1 }
 0x210   : > { %2653 = vst [vmem:[%s3412_s24 + $0x20] sm:$0xff] %v2644_v27  ;;  %v2631_v31 = vadd.f32 %v2578_v30, %v2356_v58  ;;  %v2580_v32 = vpop.f32.mrb[85].mxu1 }
 0x211   : > { %2654 = vst [vmem:[%s3412_s24 + $0x28] sm:$0xff] %v2645_v29  ;;  %v2632_v33 = vadd.f32 %v2580_v32, %v2357_v60  ;;  %v2582_v34 = vpop.f32.mrb[86].mxu1 }
 0x212   : > { %v2646_v35 = vadd.f32 %v2638_v6, %v2631_v31  ;;  %v2583_v36 = vpop.f32.mrb[87].mxu1 }
 0x213   : > { %v2647_v38 = vadd.f32 %v2638_v6, %v2632_v33  ;;  %v2619_v39 = vpop.f32.mrb[88].mxu0 }
 0x214   : > { %2655 = vst [vmem:[%s3412_s24 + $0x30] sm:$0xff] %v2646_v35  ;;  %v2633_v40 = vadd.f32 %v2619_v39, %v2358_v1  ;;  %v2892_v41 = vpop.f32.mrb[89].mxu0 }
 0x215   : > { %2656 = vst [vmem:[%s3412_s24 + $0x38] sm:$0xff] %v2647_v38  ;;  %v2622_v42 = vpop.f32.mrb[90].mxu0 }
 0x216   : > { %v2648_v43 = vadd.f32 %v2638_v6, %v2633_v40  ;;  %v2893_v44 = vpop.f32.mrb[91].mxu0 }
 0x218   : > { %2657 = vst [vmem:[%s3412_s24 + $0x40] sm:$0xff] %v2648_v43 }
 0x219 PF: > { %s13_s12 = sadd.s32 1, %s2933_s12  }
 0x21a   : > { %p10_p4 = scmp.ge.s32.totalorder %s13_s12, 4  }
 0x21c   :  { %12 = sbr.rel (!%p10_p4) target bundleno = 1 (0x1), region = 70 }

</bundles_post_ra>
